<compile_context>
chip_gen: v7x
topology: tpu7x:2x2x1
jax: 0.10.0
libtpu: 0.0.40
codegen_flags: <defaults>
</compile_context>

<pallas_src>
import functools

import jax
import jax.numpy as jnp
from jax import lax
from jax.experimental import pallas as pl
from jax.experimental.pallas import tpu as pltpu


def _default_act_dtype():
    # bf16 activations only where the VPU/EUP have a bf16 path (v6e / v7x).
    try:
        kind = jax.devices()[0].device_kind.lower()
    except Exception:
        return jnp.float32
    if ("v6" in kind) or ("v7" in kind):
        return jnp.bfloat16
    return jnp.float32


def _fcnn_fourier_kernel(t_ref, p_ref, o_ref, *, n_in, n_out, n_hidden,
                         act_dtype, lane_chunk):
    # t_ref: (n_in, Bt)   batch on the lane axis (lane-dense)
    # p_ref: (H, 2*n_in + 2*n_out + 3) packed params, VMEM-resident across grid
    # o_ref: (n_out, Bt)  lane-dense output
    H = n_hidden
    bt = t_ref.shape[1]
    n_chunks = bt // lane_chunk

    p = p_ref[...]                                    # (H, n_cols), tiny

    # Column offsets inside the packed parameter array.
    c_wsin = 0
    c_bsin = n_in
    c_wcos = n_in + 1
    c_bcos = 2 * n_in + 1
    c_wosin = 2 * n_in + 2
    c_wocos = c_wosin + n_out
    c_bout = c_wocos + n_out

    # Hoisted lane broadcasts: each (H, 1) column is broadcast to (H, chunk)
    # exactly once per tile and reused by every chunk iteration.
    def bcol(c, dtype):
        return jnp.broadcast_to(p[:, c:c + 1], (H, lane_chunk)).astype(dtype)

    bsin_b = bcol(c_bsin, act_dtype)
    bcos_b = bcol(c_bcos, act_dtype)
    wsin_b = [bcol(c_wsin + i, act_dtype) for i in range(n_in)]
    wcos_b = [bcol(c_wcos + i, act_dtype) for i in range(n_in)]
    wosin_b = [bcol(c_wosin + o, act_dtype) for o in range(n_out)]
    wocos_b = [bcol(c_wocos + o, act_dtype) for o in range(n_out)]
    b_out = p[0:n_out, c_bout:c_bout + 1]             # (n_out, 1), f32

    def chunk_body(ci, carry):
        off = pl.multiple_of(ci * lane_chunk, lane_chunk)
        t_c = t_ref[:, pl.ds(off, lane_chunk)].astype(act_dtype)   # (n_in, chunk)

        # Hidden pre-activations: bias-initialized broadcast FMA (pure VPU).
        zs = bsin_b
        zc = bcos_b
        for i in range(n_in):                         # static unroll, n_in tiny
            # One explicit sublane broadcast per feature, reused by both halves.
            ti = jnp.broadcast_to(t_c[i:i + 1, :], (H, lane_chunk))
            zs = zs + wsin_b[i] * ti
            zc = zc + wcos_b[i] * ti

        s = jnp.sin(zs)                               # EUP (bf16 on v6e/v7x)
        c = jnp.cos(zc)

        # Readout: n_out tiny -> multiply + sublane reduce over H, f32 accumulate.
        rows = []
        for o in range(n_out):                        # static unroll, n_out tiny
            r = wosin_b[o] * s + wocos_b[o] * c       # (H, chunk)
            rows.append(jnp.sum(r, axis=0, keepdims=True, dtype=jnp.float32))
        out = rows[0] if n_out == 1 else jnp.concatenate(rows, axis=0)

        o_ref[:, pl.ds(off, lane_chunk)] = (out + b_out).astype(o_ref.dtype)
        return carry

    # fori_loop bounds the live ranges of the per-chunk temporaries (a static
    # Python for would not); modest unroll keeps vreg pressure in check.
    unroll = 2 if (n_chunks % 2 == 0) else 1
    lax.fori_loop(0, n_chunks, chunk_body, None, unroll=unroll)


def fcnn_fourier_forward(t, w_sin, b_sin, w_cos, b_cos, w_out, b_out, *,
                         batch_tile=32768, lane_chunk=256, act_dtype=None):
    """Forward pass of FCNN_Fourier with PyTorch-layout parameters.

    t:      (B, n_in)
    w_sin:  (H, n_in),  b_sin: (H,)
    w_cos:  (H, n_in),  b_cos: (H,)
    w_out:  (n_out, 2H), b_out: (n_out,)
    returns (B, n_out)
    """
    B, n_in = t.shape
    H = w_sin.shape[0]
    n_out = w_out.shape[0]
    assert w_out.shape[1] == 2 * H, "output layer expects 2*n_hidden inputs"
    assert n_out <= H, "packed-parameter layout requires n_out <= n_hidden"

    if act_dtype is None:
        act_dtype = _default_act_dtype()

    # Pack everything into one (H, 2*n_in + 2*n_out + 3) f32 array -> one DMA:
    # [W_sin | b_sin | W_cos | b_cos | Wo_sin | Wo_cos | b_out (zero-padded col)]
    b_out_col = jnp.zeros((H, 1), jnp.float32).at[:n_out, 0].set(
        b_out.astype(jnp.float32))
    params = jnp.concatenate(
        [w_sin.astype(jnp.float32),
         b_sin[:, None].astype(jnp.float32),
         w_cos.astype(jnp.float32),
         b_cos[:, None].astype(jnp.float32),
         w_out[:, :H].T.astype(jnp.float32),          # (H, n_out)  sin half
         w_out[:, H:].T.astype(jnp.float32),          # (H, n_out)  cos half
         b_out_col],
        axis=1)
    n_cols = params.shape[1]

    # Feature-major layout: batch on the lane (last) axis.
    t_fm = t.T.astype(jnp.float32)                    # (n_in, B)

    # Lane-chunk-aligned batch tile.  No explicit padding copy: the grid uses
    # cdiv and Pallas masks the ragged final block on writeback.
    lane_chunk = max(128, (lane_chunk // 128) * 128)
    bt = min(batch_tile, pl.cdiv(B, lane_chunk) * lane_chunk)
    bt = max(lane_chunk, (bt // lane_chunk) * lane_chunk)
    n_tiles = pl.cdiv(B, bt)

    kernel = functools.partial(_fcnn_fourier_kernel, n_in=n_in, n_out=n_out,
                               n_hidden=H, act_dtype=act_dtype,
                               lane_chunk=lane_chunk)

    out_fm = pl.pallas_call(
        kernel,
        out_shape=jax.ShapeDtypeStruct((n_out, B), t.dtype),
        grid=(n_tiles,),
        in_specs=[
            pl.BlockSpec((n_in, bt), lambda i: (0, i)),    # batch-tiled input
            pl.BlockSpec((H, n_cols), lambda i: (0, 0)),   # weights stay resident
        ],
        out_specs=pl.BlockSpec((n_out, bt), lambda i: (0, i)),
        compiler_params=pltpu.CompilerParams(
            dimension_semantics=("parallel",)),            # 2-TC split on v7x
    )(t_fm, params)

    return out_fm.T                                        # (B, n_out)


if __name__ == "__main__":
    key = jax.random.PRNGKey(0)
    k_t, k1, k2, k3, k4, k5, k6 = jax.random.split(key, 7)

    B, n_in, H, n_out = 8, 1, 32, 1

    def lin_init(kw, kb, fan_in, fan_out):
        # Mirrors nn.Linear's U(-1/sqrt(fan_in), 1/sqrt(fan_in)); W is (out, in).
        bound = 1.0 / jnp.sqrt(jnp.float32(fan_in))
        w = jax.random.uniform(kw, (fan_out, fan_in), jnp.float32, -bound, bound)
        b = jax.random.uniform(kb, (fan_out,), jnp.float32, -bound, bound)
        return w, b

    w_sin, b_sin = lin_init(k1, k2, n_in, H)
    w_cos, b_cos = lin_init(k3, k4, n_in, H)
    w_out, b_out = lin_init(k5, k6, 2 * H, n_out)

    def ref_forward(x):
        return jnp.concatenate(
            [jnp.sin(x @ w_sin.T + b_sin), jnp.cos(x @ w_cos.T + b_cos)],
            axis=1) @ w_out.T + b_out

    # Small batch, strict f32 check against the pure-JAX reference.
    t = jax.random.normal(k_t, (B, n_in), jnp.float32)
    out = jax.block_until_ready(
        fcnn_fourier_forward(t, w_sin, b_sin, w_cos, b_cos, w_out, b_out,
                             act_dtype=jnp.float32))
    assert out.shape == (B, n_out)
    assert jnp.allclose(out, ref_forward(t), atol=1e-5, rtol=1e-5)

    # Ragged batch: exercises the multi-chunk loop and the masked final block
    # (no explicit padding copy in the wrapper).
    B2 = 1333
    t2 = jax.random.normal(jax.random.PRNGKey(1), (B2, n_in), jnp.float32)
    out2 = jax.block_until_ready(
        fcnn_fourier_forward(t2, w_sin, b_sin, w_cos, b_cos, w_out, b_out,
                             act_dtype=jnp.float32))
    assert jnp.allclose(out2, ref_forward(t2), atol=1e-5, rtol=1e-5)

    # Default activation dtype (bf16 on v6e/v7x, f32 elsewhere): sanity check
    # with a loose tolerance appropriate for bf16 sin/cos.
    out3 = jax.block_until_ready(
        fcnn_fourier_forward(t2, w_sin, b_sin, w_cos, b_cos, w_out, b_out))
    assert jnp.allclose(out3, ref_forward(t2), atol=0.25, rtol=0.25)

    print("KERNEL_OK")
</pallas_src>

<mosaic_0001>
module attributes {stable_mosaic.version = 11 : i64} {
  func.func @_fcnn_fourier_kernel(%arg0: i32, %arg1: memref<1x256xf32, #tpu.memory_space<vmem>>, %arg2: memref<32x7xf32, #tpu.memory_space<vmem>>, %arg3: memref<1x256xf32, #tpu.memory_space<vmem>>) attributes {dimension_semantics = [#tpu.dimension_semantics<parallel>], iteration_bounds = array<i64: 1>, scalar_prefetch = 0 : i64, scratch_operands = 0 : i64, tpu.core_type = #tpu.core_type<tc>, window_params = [{transform_indices = @transform_0, window_bounds = array<i64: 1, 256>}, {pipeline_mode = #tpu.pipeline_mode<synchronous>, transform_indices = @transform_1, window_bounds = array<i64: 32, 7>}, {transform_indices = @transform_2, window_bounds = array<i64: 1, 256>}]} {
    %c0 = arith.constant 0 : index
    %c0_0 = arith.constant 0 : index
    %0 = vector.load %arg2[%c0, %c0_0] : memref<32x7xf32, #tpu.memory_space<vmem>>, vector<32x7xf32>
    %1 = vector.extract_strided_slice %0 {offsets = [0, 1], sizes = [32, 1], strides = [1, 1]} : vector<32x7xf32> to vector<32x1xf32>
    %2 = vector.shape_cast %1 : vector<32x1xf32> to vector<32x1xf32>
    %3 = vector.broadcast %2 : vector<32x1xf32> to vector<32x256xf32>
    %4 = vector.extract_strided_slice %0 {offsets = [0, 3], sizes = [32, 1], strides = [1, 1]} : vector<32x7xf32> to vector<32x1xf32>
    %5 = vector.shape_cast %4 : vector<32x1xf32> to vector<32x1xf32>
    %6 = vector.broadcast %5 : vector<32x1xf32> to vector<32x256xf32>
    %7 = vector.extract_strided_slice %0 {offsets = [0, 0], sizes = [32, 1], strides = [1, 1]} : vector<32x7xf32> to vector<32x1xf32>
    %8 = vector.shape_cast %7 : vector<32x1xf32> to vector<32x1xf32>
    %9 = vector.broadcast %8 : vector<32x1xf32> to vector<32x256xf32>
    %10 = vector.extract_strided_slice %0 {offsets = [0, 2], sizes = [32, 1], strides = [1, 1]} : vector<32x7xf32> to vector<32x1xf32>
    %11 = vector.shape_cast %10 : vector<32x1xf32> to vector<32x1xf32>
    %12 = vector.broadcast %11 : vector<32x1xf32> to vector<32x256xf32>
    %13 = vector.extract_strided_slice %0 {offsets = [0, 4], sizes = [32, 1], strides = [1, 1]} : vector<32x7xf32> to vector<32x1xf32>
    %14 = vector.shape_cast %13 : vector<32x1xf32> to vector<32x1xf32>
    %15 = vector.broadcast %14 : vector<32x1xf32> to vector<32x256xf32>
    %16 = vector.extract_strided_slice %0 {offsets = [0, 5], sizes = [32, 1], strides = [1, 1]} : vector<32x7xf32> to vector<32x1xf32>
    %17 = vector.shape_cast %16 : vector<32x1xf32> to vector<32x1xf32>
    %18 = vector.broadcast %17 : vector<32x1xf32> to vector<32x256xf32>
    %19 = vector.extract_strided_slice %0 {offsets = [0, 6], sizes = [1, 1], strides = [1, 1]} : vector<32x7xf32> to vector<1x1xf32>
    %c0_i32 = arith.constant 0 : i32
    %c256_i32 = arith.constant 256 : i32
    %20 = arith.muli %c0_i32, %c256_i32 : i32
    %21 = tpu.assume_multiple %20, 256 : i32
    %c0_1 = arith.constant 0 : index
    %22 = arith.index_cast %21 : i32 to index
    %23 = vector.load %arg1[%c0_1, %22] : memref<1x256xf32, #tpu.memory_space<vmem>>, vector<1x256xf32>
    %24 = vector.shape_cast %23 : vector<1x256xf32> to vector<1x256xf32>
    %25 = vector.broadcast %24 : vector<1x256xf32> to vector<32x256xf32>
    %26 = arith.mulf %9, %25 : vector<32x256xf32>
    %27 = arith.addf %3, %26 : vector<32x256xf32>
    %28 = arith.mulf %12, %25 : vector<32x256xf32>
    %29 = arith.addf %6, %28 : vector<32x256xf32>
    %30 = math.sin %27 : vector<32x256xf32>
    %31 = math.cos %29 : vector<32x256xf32>
    %32 = arith.mulf %15, %30 : vector<32x256xf32>
    %33 = arith.mulf %18, %31 : vector<32x256xf32>
    %34 = arith.addf %32, %33 : vector<32x256xf32>
    %cst = arith.constant dense<0.000000e+00> : vector<256xf32>
    %35 = vector.multi_reduction <add>, %34, %cst [0] : vector<32x256xf32> to vector<256xf32>
    %36 = vector.shape_cast %35 : vector<256xf32> to vector<1x256xf32>
    %37 = vector.broadcast %19 : vector<1x1xf32> to vector<1x256xf32>
    %38 = arith.addf %36, %37 : vector<1x256xf32>
    %c0_2 = arith.constant 0 : index
    %39 = arith.index_cast %21 : i32 to index
    %40 = vector.load %arg3[%c0_2, %39] : memref<1x256xf32, #tpu.memory_space<vmem>>, vector<1x256xf32>
    tpu.vector_store %arg3[%c0_2, %39], %38 {strides = array<i32>} : memref<1x256xf32, #tpu.memory_space<vmem>>, vector<1x256xf32>,
    %c1_i32 = arith.constant 1 : i32
    return
  }
  func.func @transform_0(%arg0: i32) -> (i32, i32) {
    %c0_i32 = arith.constant 0 : i32
    %c0_i32_0 = arith.constant 0 : i32
    return %c0_i32, %arg0 : i32, i32
  }
  func.func @transform_1(%arg0: i32) -> (i32, i32) {
    %c0_i32 = arith.constant 0 : i32
    %c0_i32_0 = arith.constant 0 : i32
    %c0_i32_1 = arith.constant 0 : i32
    return %c0_i32, %c0_i32_0 : i32, i32
  }
  func.func @transform_2(%arg0: i32) -> (i32, i32) {
    %c0_i32 = arith.constant 0 : i32
    %c0_i32_0 = arith.constant 0 : i32
    return %c0_i32, %arg0 : i32, i32
  }
}

</mosaic_0001>

<bundles_post_ra>
// kernel: tpu_custom_call.1
= control target key start
LH: loop header
LB: loop body
LE: loop exit
PB: predicated region body
PF: predicated region fallthrough
CT: control target
= control target key end

     0   :  { %v2153_v1 = vmov 2   ;;  %v2154_v2 = vmov 0   ;;  %s4548_s0 = inlined_call_operand.vmem [shape: f32[1,8], index: 0, kind: input, shape index: {}]   ;;  %s4549_s1 = inlined_call_operand.vmem [shape: f32[32,7], index: 1, kind: input, shape index: {}]   ;;  %s4550_s2 = inlined_call_operand.hbm [shape: f32[1,8], index: 2, kind: output, shape index: {}]  }
   0x1   :  { %v12_v0 = vld [vmem:[%s4549_s1] sm:$0xff]  ;;  %2045 = vset.pattern.permute.xlu1 %v2153_v1  ;;  %2044 = vset.pattern.permute.xlu0 %v2154_v2 }
   0x2   :  { %69 = vperm.xlu1 %2045, %v12_v0   ;;  %53 = vperm.xlu0 %2044, %v12_v0  }
   0x3   :  { %7 = vsyncpa [#allocation3], 0  ;;  %v13_v3 = vld [vmem:[%s4549_s1 + $0x8] sm:$0xff]  ;;  %v2155_v4 = vmov 1   ;;  %v2156_v5 = vmov 3   ;;  %v14_v6 = vld [vmem:[%s4549_s1 + $0x10] sm:$0xff]  ;;  %v4551_v11 = vlaneseq }
   0x4   :  { %v15_v7 = vld [vmem:[%s4549_s1 + $0x18] sm:$0xff]  ;;  %v2157_v8 = vmov 5   ;;  %v2158_v9 = vmov 4   ;;  %v2159_v10 = vmov 6   ;;  %v116_v16 = vld [vmem:[%s4548_s0] sm:$0x3] }
   0x5   :  { %v2196_v13 = vshrl.u32 %v4551_v11, 7 }
   0x6   :  { %73 = vperm.xlu1 %2045, %v13_v3   ;;  %57 = vperm.xlu0 %2044, %v13_v3  }
   0x7   :  { %4696 = vst [vmem:[#allocation5_spill] sm:$0xff] %v2196_v13  ;;  %v120_v15 = vsub.s32 0, %v2196_v13  ;;  %v124_v18 = vsub.s32 1, %v2196_v13 }
   0x9   :  { %v2203_v19 = vrot.slane %v116_v16, %v120_v15  ;;  %v2206_v22 = vrot.slane %v116_v16, %v124_v18 }
   0xa   :  { %2046 = vset.pattern.permute.xlu1 %v2155_v4  ;;  %2048 = vset.pattern.permute.xlu0 %v2156_v5 }
   0xb   :  { %23 = vperm.xlu1 %2046, %v13_v3   ;;  %41 = vperm.xlu0 %2048, %v13_v3  }
   0xf   :  { %2047 = vset.pattern.permute.xlu1 %v2156_v5  ;;  %2049 = vset.pattern.permute.xlu0 %v2155_v4 }
  0x10   :  { %37 = vperm.xlu1 %2047, %v12_v0   ;;  %18 = vperm.xlu0 %2049, %v12_v0  }
  0x14   :  { %2050 = vset.pattern.permute.xlu1 %v2154_v2  ;;  %28 = vperm.xlu0 %2049, %v14_v6  }
  0x15   :  { %61 = vperm.xlu1 %2050, %v14_v6  }
  0x18   :  { %2054 = vset.pattern.permute.xlu0 %v2153_v1 }
  0x19   :  { %2051 = vset.pattern.permute.xlu1 %v2153_v1  ;;  %81 = vperm.xlu0 %2054, %v15_v7  }
  0x1a   :  { %77 = vperm.xlu1 %2051, %v14_v6  }
  0x1d   :  { %2059 = vset.pattern.permute.xlu0 %v2157_v8 }
  0x1e   :  { %2052 = vset.pattern.permute.xlu1 %v2156_v5  ;;  %105 = vperm.xlu0 %2059, %v13_v3  }
  0x1f   :  { %45 = vperm.xlu1 %2052, %v14_v6  }
  0x22   :  { %2060 = vset.pattern.permute.xlu0 %v2158_v9 }
  0x23   :  { %2053 = vset.pattern.permute.xlu1 %v2154_v2  ;;  %85 = vperm.xlu0 %2060, %v12_v0  }
  0x24   :  { %65 = vperm.xlu1 %2053, %v15_v7  }
  0x27   :  { %97 = vperm.xlu0 %2060, %v15_v7  }
  0x28   :  { %2055 = vset.pattern.permute.xlu1 %v2155_v4 }
  0x29   :  { %33 = vperm.xlu1 %2055, %v15_v7  }
  0x2b   :  { %2064 = vset.pattern.permute.xlu0 %v2159_v10 }
  0x2d   :  { %2056 = vset.pattern.permute.xlu1 %v2156_v5 }
  0x2e   :  { %49 = vperm.xlu1 %2056, %v15_v7  }
  0x32   :  { %2057 = vset.pattern.permute.xlu1 %v2158_v9 }
  0x33   :  { %89 = vperm.xlu1 %2057, %v13_v3  }
  0x37   :  { %2058 = vset.pattern.permute.xlu1 %v2157_v8 }
  0x38   :  { %101 = vperm.xlu1 %2058, %v12_v0  }
  0x3c   :  { %2061 = vset.pattern.permute.xlu1 %v2158_v9 }
  0x3d   :  { %93 = vperm.xlu1 %2061, %v14_v6  }
  0x41   :  { %2062 = vset.pattern.permute.xlu1 %v2157_v8 }
  0x42   :  { %109 = vperm.xlu1 %2062, %v14_v6  }
  0x46   :  { %113 = vperm.xlu1 %2062, %v15_v7  }
  0x4a   :  { %2063 = vset.pattern.permute.xlu1 %v2159_v10 }
  0x4b   :  { %1859 = vperm.xlu1 %2063, %v12_v0  }
  0x81   :  { %v70_v12 = vpop.permute.xlu1 %69  ;;  %v54_v14 = vpop.permute.xlu0 %53 }
  0x82   :  { %v144_v41 = vmul.f32 %v2203_v19, %v70_v12  ;;  %v145_v45 = vmul.f32 %v2206_v22, %v70_v12  ;;  %v128_v46 = vmul.f32 %v2203_v19, %v54_v14  ;;  %v129_v58 = vmul.f32 %v2206_v22, %v54_v14 }
  0x85   :  { %v74_v17 = vpop.permute.xlu1 %73  ;;  %v58_v20 = vpop.permute.xlu0 %57 }
  0x86   :  { %v130_v21 = vmul.f32 %v2203_v19, %v58_v20  ;;  %v131_v24 = vmul.f32 %v2206_v22, %v58_v20  ;;  %v146_v27 = vmul.f32 %v2203_v19, %v74_v17  ;;  %v147_v29 = vmul.f32 %v2206_v22, %v74_v17 }
  0x87   :  { %v4561_v20 = vmov 2102212464  }
  0x8a   :  { %v24_v23 = vpop.permute.xlu1 %23  ;;  %v42_v26 = vpop.permute.xlu0 %41 }
  0x8b   :  { %v2209_v25 = vadd.f32 %v130_v21, %v24_v23  ;;  %v2212_v28 = vadd.f32 %v131_v24, %v24_v23  ;;  %v2216_v31 = vadd.f32 %v146_v27, %v42_v26  ;;  %v2218_v32 = vadd.f32 %v147_v29, %v42_v26 }
  0x8c   :  { %v4573_v23 = vmov 920167782  }
  0x8d   :  { %4697 = vst [vmem:[#allocation6_spill] sm:$0xff] %v2209_v25  ;;  %v371_v30 = vand.u32 2139095040, %v2209_v25  ;;  %4698 = vst [vmem:[#allocation7_spill] sm:$0xff] %v2218_v32  ;;  %v475_v33 = vand.u32 2139095040, %v2212_v28  ;;  %v1201_v35 = vand.u32 2139095040, %v2216_v31  ;;  %v1304_v36 = vand.u32 2139095040, %v2218_v32 }
  0x8f   :  { %v372_v34 = vshrl.u32 %v371_v30, 23  ;;  %v476_v37 = vshrl.u32 %v475_v33, 23  ;;  %v1202_v39 = vshrl.u32 %v1201_v35, 23  ;;  %v38_v40 = vpop.permute.xlu1 %37  ;;  %v1305_v42 = vshrl.u32 %v1304_v36, 23  ;;  %v19_v49 = vpop.permute.xlu0 %18 }
  0x90   :  { %v2224_v44 = vadd.f32 %v144_v41, %v38_v40  ;;  %v2228_v51 = vadd.f32 %v145_v45, %v38_v40  ;;  %v2231_v55 = vadd.f32 %v128_v46, %v19_v49  ;;  %v2238_v3 = vadd.f32 %v129_v58, %v19_v49 }
  0x91   :  { %v1909_v38 = vadd.s32 4294967169, %v372_v34  ;;  %v1913_v43 = vadd.s32 4294967169, %v476_v37  ;;  %v1941_v48 = vadd.s32 4294967169, %v1202_v39  ;;  %v1945_v50 = vadd.s32 4294967169, %v1305_v42 }
  0x92   :  { %4699 = vst [vmem:[#allocation8_spill] sm:$0xff] %v2224_v44  ;;  %4700 = vst [vmem:[#allocation9_spill] sm:$0xff] %v2228_v51  ;;  %v995_v53 = vand.u32 2139095040, %v2224_v44  ;;  %v1098_v57 = vand.u32 2139095040, %v2228_v51  ;;  %v163_v61 = vand.u32 2139095040, %v2231_v55  ;;  %v267_v14 = vand.u32 2139095040, %v2238_v3 }
  0x93   :  { %v378_v47 = vadd.s32 1, %v1909_v38  ;;  %v482_v52 = vadd.s32 1, %v1913_v43  ;;  %v1208_v54 = vadd.s32 1, %v1941_v48  ;;  %4701 = vst [vmem:[#allocation10_spill] sm:$0xff] %v2231_v55  ;;  %v1311_v56 = vadd.s32 1, %v1945_v50  ;;  %4702 = vst [vmem:[#allocation11_spill] sm:$0xff] %v2238_v3 }
  0x94   :  { %v996_v60 = vshrl.u32 %v995_v53, 23  ;;  %v1099_v0 = vshrl.u32 %v1098_v57, 23  ;;  %v164_v4 = vshrl.u32 %v163_v61, 23  ;;  %v62_v29 = vpop.permute.xlu1 %61  ;;  %v4567_v35 = vmov 1326507024  }
  0x95   :  { %vm379_vm0 = vcmp.gt.s32.totalorder %v378_v47, 0  ;;  %vm483_vm1 = vcmp.gt.s32.totalorder %v482_v52, 0  ;;  %vm1209_vm2 = vcmp.gt.s32.totalorder %v1208_v54, 0  ;;  %vm1312_vm3 = vcmp.gt.s32.totalorder %v1311_v56, 0 }
  0x96   :  { %v380_v59 = vsel %vm379_vm0, %v378_v47, 0  ;;  %v484_v63 = vsel %vm483_vm1, %v482_v52, 0  ;;  %v1210_v1 = vsel %vm1209_vm2, %v1208_v54, 0  ;;  %v1933_v2 = vadd.s32 4294967169, %v996_v60  ;;  %v29_v47 = vpop.permute.xlu0 %28 }
  0x97   :  { %v2236_v62 = vand.u32 31, %v380_v59  ;;  %v2240_v5 = vand.u32 31, %v484_v63  ;;  %v1313_v6 = vsel %vm1312_vm3, %v1311_v56, 0  ;;  %v2242_v7 = vshrl.u32 %v380_v59, 5 }
  0x98   :  { %v2247_v9 = vand.u32 31, %v1210_v1  ;;  %v1937_v10 = vadd.s32 4294967169, %v1099_v0  ;;  %v1002_v12 = vadd.s32 1, %v1933_v2  ;;  %v2250_v15 = vand.u32 31, %v1313_v6 }
  0x99   :  { %v2245_v8 = vsub.s32 32, %v2236_v62  ;;  %v1901_v16 = vadd.s32 4294967169, %v164_v4  ;;  %v394_v21 = vshll.u32 %v4561_v20, %v2236_v62  ;;  %v397_v24 = vshll.u32 %v4573_v23, %v2236_v62  ;;  %v78_v60 = vpop.permute.xlu1 %77 }
  0x9a   :  { %v2258_v26 = vshrl.u32 %v484_v63, 5  ;;  %v2261_v27 = vsub.s32 32, %v2240_v5  ;;  %vm403_vm4 = vcmp.lt.s32.totalorder %v2242_v7, 4  ;;  %v2267_v33 = vsub.s32 32, %v2247_v9 }
  0x9b   :  { %v395_v30 = vshrl.u32 %v4573_v23, %v2245_v8  ;;  %v1105_v34 = vadd.s32 1, %v1937_v10  ;;  %v398_v36 = vshrl.u32 %v4567_v35, %v2245_v8  ;;  %v498_v37 = vshll.u32 %v4561_v20, %v2240_v5 }
  0x9c   :  { %vm1003_vm5 = vcmp.gt.s32.totalorder %v1002_v12, 0  ;;  %v268_v38 = vshrl.u32 %v267_v14, 23  ;;  %v501_v39 = vshll.u32 %v4573_v23, %v2240_v5  ;;  %v2276_v40 = vsub.s32 32, %v2250_v15 }
  0x9d   :  { %v170_v41 = vadd.s32 1, %v1901_v16  ;;  %v132_v42 = vmul.f32 %v2203_v19, %v62_v29  ;;  %v499_v43 = vshrl.u32 %v4573_v23, %v2261_v27  ;;  %v502_v45 = vshrl.u32 %v4567_v35, %v2261_v27 }
  0x9e   :  { %vm507_vm6 = vcmp.lt.s32.totalorder %v2258_v26, 4  ;;  %v2284_v46 = vshrl.u32 %v1210_v1, 5  ;;  %v2286_v48 = vor.u32 %v395_v30, %v394_v21  ;;  %v1225_v49 = vshrl.u32 %v4573_v23, %v2267_v33 }
  0x9f   :  { %v1004_v50 = vsel %vm1003_vm5, %v1002_v12, 0  ;;  %vm1106_vm7 = vcmp.gt.s32.totalorder %v1105_v34, 0  ;;  %v399_v52 = vor.u32 %v398_v36, %v397_v24  ;;  %v1228_v53 = vshrl.u32 %v4567_v35, %v2267_v33 }
  0xa0   :  { %v2292_v54 = vshrl.u32 %v1313_v6, 5  ;;  %v1905_v56 = vadd.s32 4294967169, %v268_v38  ;;  %v1224_v57 = vshll.u32 %v4561_v20, %v2247_v9  ;;  %v1328_v58 = vshrl.u32 %v4573_v23, %v2276_v40 }
  0xa1   :  { %vm171_vm8 = vcmp.gt.s32.totalorder %v170_v41, 0  ;;  %v2298_v59 = vadd.f32 %v132_v42, %v29_v47  ;;  %v2300_v61 = vor.u32 %v499_v43, %v498_v37  ;;  %v1227_v63 = vshll.u32 %v4573_v23, %v2247_v9  ;;  %v46_v43 = vpop.permute.xlu1 %45 }
  0xa2   :  { %v2304_v0 = vand.u32 31, %v1004_v50  ;;  %v1107_v1 = vsel %vm1106_vm7, %v1105_v34, 0  ;;  %v2309_v2 = vsel %vm403_vm4, %v2286_v48, 920167782  ;;  %v503_v4 = vor.u32 %v502_v45, %v501_v39 }
  0xa3   :  { %4703 = vst [vmem:[#allocation12_spill] sm:$0xff] %v2298_v59  ;;  %v2311_v6 = vor.u32 %v1225_v49, %v1224_v57  ;;  %v1327_v10 = vshll.u32 %v4561_v20, %v2250_v15  ;;  %v1229_v12 = vor.u32 %v1228_v53, %v1227_v63  ;;  %v172_v14 = vsel %vm171_vm8, %v170_v41, 0 }
  0xa4   :  { %4704 = vst [vmem:[#allocation13_spill] sm:$0xff] %v2304_v0  ;;  %v274_v16 = vadd.s32 1, %v1905_v56  ;;  %v133_v21 = vmul.f32 %v2206_v22, %v62_v29  ;;  %v1331_v30 = vshrl.u32 %v4567_v35, %v2276_v40  ;;  %v2320_v34 = vand.u32 31, %v1107_v1 }
  0xa5   :  { %v2316_v24 = vor.u32 %v1328_v58, %v1327_v10  ;;  %v579_v36 = vand.u32 2139095040, %v2298_v59  ;;  %v2325_v37 = vsel %vm403_vm4, %v399_v52, 1326507024  ;;  %v2330_v38 = vsel %vm507_vm6, %v2300_v61, 920167782 }
  0xa6   :  { %4706 = vst [vmem:[#allocation15_spill] sm:$0xff] %v2320_v34  ;;  %vm1233_vm9 = vcmp.lt.s32.totalorder %v2284_v46, 4  ;;  %v2334_v29 = vsub.s32 32, %v2304_v0  ;;  %v2338_v39 = vsel %vm507_vm6, %v503_v4, 1326507024  ;;  %v1330_v41 = vshll.u32 %v4573_v23, %v2250_v15 }
  0xa7   :  { %4705 = vst [vmem:[#allocation14_spill] sm:$0xff] %v2316_v24  ;;  %vm1336_vm10 = vcmp.lt.s32.totalorder %v2292_v54, 4  ;;  %v2343_v42 = vand.u32 31, %v172_v14  ;;  %v2348_v45 = vsel %vm1233_vm9, %v2311_v6, 920167782  ;;  %vm275_vm11 = vcmp.gt.s32.totalorder %v274_v16, 0 }
  0xa8   :  { %4707 = vst [vmem:[#allocation16_spill] sm:$0xff] %v2334_v29  ;;  %v2352_v49 = vsel %vm1233_vm9, %v1229_v12, 1326507024  ;;  %v2354_v52 = vadd.f32 %v133_v21, %v29_v47  ;;  %v1332_v53 = vor.u32 %v1331_v30, %v1330_v41  ;;  %v2359_v56 = vsel %vm1336_vm10, %v2316_v24, 920167782 }
  0xa9   :  { %4708 = vst [vmem:[#allocation17_spill] sm:$0xff] %v2343_v42  ;;  %v2362_v57 = vsub.s32 32, %v2320_v34  ;;  %v580_v58 = vshrl.u32 %v579_v36, 23  ;;  %v2364_v63 = vshrl.u32 %v1004_v50, 5  ;;  %v1019_v4 = vshrl.u32 %v4573_v23, %v2334_v29 }
  0xaa   :  { %4709 = vst [vmem:[#allocation18_spill] sm:$0xff] %v2354_v52  ;;  %v1022_v10 = vshrl.u32 %v4567_v35, %v2334_v29  ;;  %v148_v47 = vmul.f32 %v2203_v19, %v78_v60  ;;  %v1018_v12 = vshll.u32 %v4561_v20, %v2304_v0  ;;  %v2373_v21 = vshrl.u32 %v1107_v1, 5 }
  0xab   :  { %4710 = vst [vmem:[#allocation19_spill] sm:$0xff] %v2362_v57  ;;  %4711 = vst [vmem:[#allocation20_spill] sm:$0xff] %v2364_v63  ;;  %v2376_v30 = vsub.s32 32, %v2343_v42  ;;  %v276_v41 = vsel %vm275_vm11, %v274_v16, 0  ;;  %v1021_v50 = vshll.u32 %v4573_v23, %v2304_v0  ;;  %v1121_v36 = vshll.u32 %v4561_v20, %v2320_v34  ;;  %v66_v16 = vpop.permute.xlu1 %65 }
  0xac   :  { %4712 = vst [vmem:[#allocation21_spill] sm:$0xff] %v2373_v21  ;;  %v683_v11 = vand.u32 2139095040, %v2354_v52  ;;  %v2383_v18 = vadd.f32 %v148_v47, %v46_v43  ;;  %v1122_v17 = vshrl.u32 %v4573_v23, %v2362_v57  ;;  %v1125_v1 = vshrl.u32 %v4567_v35, %v2362_v57 }
  0xad   :  { %4713 = vst [vmem:[#allocation22_spill] sm:$0xff] %v2376_v30  ;;  %v2389_v13 = vshrl.u32 %v172_v14, 5  ;;  %v1917_v59 = vadd.s32 4294967169, %v580_v58  ;;  %v2391_v3 = vor.u32 %v1019_v4, %v1018_v12  ;;  %v1023_v55 = vor.u32 %v1022_v10, %v1021_v50 }
  0xae   :  { %4714 = vst [vmem:[#allocation23_spill] sm:$0xff] %v2383_v18  ;;  %v2393_v51 = vand.u32 31, %v276_v41  ;;  %v149_v20 = vmul.f32 %v2206_v22, %v78_v60  ;;  %v4718_v47 = vmov 2102212464   ;;  %v187_v0 = vshrl.u32 %v4573_v23, %v2376_v30 }
  0xaf   :  { %4715 = vst [vmem:[#allocation24_spill] sm:$0xff] %v2389_v13  ;;  %4716 = vst [vmem:[#allocation25_spill] sm:$0xff] %v2391_v3  ;;  %v186_v52 = vshll.u32 %v4718_v47, %v2343_v42  ;;  %v189_v35 = vshll.u32 %v4573_v23, %v2343_v42  ;;  %v4719_v14 = vmov 1326507024   ;;  %v1124_v4 = vshll.u32 %v4573_v23, %v2320_v34 }
  0xb0   :  { %4717 = vst [vmem:[#allocation26_spill] sm:$0xff] %v2393_v51  ;;  %v190_v58 = vshrl.u32 %v4719_v14, %v2376_v30  ;;  %v684_v10 = vshrl.u32 %v683_v11, 23  ;;  %v2406_v12 = vadd.f32 %v149_v20, %v46_v43  ;;  %v1407_v60 = vand.u32 2139095040, %v2383_v18 }
  0xb1   :  { %v2411_v50 = vsel %vm1336_vm10, %v1332_v53, 1326507024  ;;  %vm1027_vm12 = vcmp.lt.s32.totalorder %v2364_v63, 4  ;;  %vm1130_vm13 = vcmp.lt.s32.totalorder %v2373_v21, 4  ;;  %v586_v42 = vadd.s32 1, %v1917_v59  ;;  %v34_v59 = vpop.permute.xlu1 %33 }
  0xb2   :  { %4720 = vst [vmem:[#allocation27_spill] sm:$0xff] %v2406_v12  ;;  %v2418_v30 = vsel %vm1027_vm12, %v2391_v3, 920167782  ;;  %v2420_v23 = vor.u32 %v1122_v17, %v1121_v36  ;;  %v1126_v11 = vor.u32 %v1125_v1, %v1124_v4  ;;  %v2423_v20 = vsub.s32 32, %v2393_v51 }
  0xb3   :  { %4721 = vst [vmem:[#allocation28_spill] sm:$0xff] %v2418_v30  ;;  %v2427_v43 = vsel %vm1027_vm12, %v1023_v55, 1326507024  ;;  %v2429_v53 = vor.u32 %v187_v0, %v186_v52  ;;  %v191_v18 = vor.u32 %v190_v58, %v189_v35  ;;  %vm195_vm14 = vcmp.lt.s32.totalorder %v2389_v13, 4 }
  0xb4   :  { %4722 = vst [vmem:[#allocation29_spill] sm:$0xff] %v2420_v23  ;;  %4723 = vst [vmem:[#allocation30_spill] sm:$0xff] %v2423_v20  ;;  %v1921_v34 = vadd.s32 4294967169, %v684_v10  ;;  %v1408_v57 = vshrl.u32 %v1407_v60, 23  ;;  %v1510_v30 = vand.u32 2139095040, %v2406_v12  ;;  %v134_v17 = vmul.f32 %v2203_v19, %v66_v16 }
  0xb5   :  { %4724 = vst [vmem:[#allocation31_spill] sm:$0xff] %v2427_v43  ;;  %4725 = vst [vmem:[#allocation32_spill] sm:$0xff] %v2429_v53  ;;  %v2434_v36 = vshrl.u32 %v276_v41, 5  ;;  %v290_v1 = vshll.u32 %v4718_v47, %v2393_v51  ;;  %vm587_vm15 = vcmp.gt.s32.totalorder %v586_v42, 0  ;;  %v135_v55 = vmul.f32 %v2206_v22, %v66_v16 }
  0xb6   :  { %v4727_v0 = vmov 920167782   ;;  %v294_v58 = vshrl.u32 %v4719_v14, %v2423_v20  ;;  %v2445_v4 = vadd.f32 %v134_v17, %v34_v59  ;;  %v2450_v41 = vsel %vm1130_vm13, %v2420_v23, 920167782 }
  0xb7   :  { %4726 = vst [vmem:[#allocation33_spill] sm:$0xff] %v2434_v36  ;;  %v291_v35 = vshrl.u32 %v4727_v0, %v2423_v20  ;;  %v293_v52 = vshll.u32 %v4727_v0, %v2393_v51  ;;  %4729 = vst [vmem:[#allocation35_spill] sm:$0xff] %v2450_v41  ;;  %v2454_v10 = vsel %vm1130_vm13, %v1126_v11, 1326507024  ;;  %v2459_v16 = vsel %vm195_vm14, %v2429_v53, 920167782 }
  0xb8   :  { %4728 = vst [vmem:[#allocation34_spill] sm:$0xff] %v2445_v4  ;;  %4730 = vst [vmem:[#allocation36_spill] sm:$0xff] %v2454_v10  ;;  %v2461_v60 = vadd.f32 %v135_v55, %v34_v59  ;;  %v588_v12 = vsel %vm587_vm15, %v586_v42, 0  ;;  %v690_v20 = vadd.s32 1, %v1921_v34  ;;  %v1949_v17 = vadd.s32 4294967169, %v1408_v57 }
  0xb9   :  { %4731 = vst [vmem:[#allocation37_spill] sm:$0xff] %v2459_v16  ;;  %v1511_v51 = vshrl.u32 %v1510_v30, 23  ;;  %v2465_v3 = vsel %vm195_vm14, %v191_v18, 1326507024  ;;  %v4600_v23 = vmov 2475754826   ;;  %v392_v59 = vshrl.u32 %v4718_v47, %v2245_v8 }
  0xba   :  { %4732 = vst [vmem:[#allocation38_spill] sm:$0xff] %v2461_v60  ;;  %4733 = vst [vmem:[#allocation39_spill] sm:$0xff] %v2465_v3  ;;  %v386_v11 = vshrl.u32 %v4600_v23, %v2245_v8  ;;  %v4598_v10 = vmov 2131351028   ;;  %v2473_v55 = vor.u32 %v291_v35, %v290_v1  ;;  %v295_v34 = vor.u32 %v294_v58, %v293_v52  ;;  %v82_v58 = vpop.permute.xlu0 %81 }
  0xbb   :  { %v389_v41 = vshrl.u32 %v4598_v10, %v2245_v8  ;;  %vm299_vm0 = vcmp.lt.s32.totalorder %v2434_v36, 4  ;;  %v787_v42 = vand.u32 2139095040, %v2445_v4  ;;  %v2477_v18 = vand.u32 31, %v588_v12 }
  0xbc   :  { %4734 = vst [vmem:[#allocation40_spill] sm:$0xff] %v2473_v55  ;;  %v4596_v57 = vmov 683565275   ;;  %v388_v16 = vshll.u32 %v4600_v23, %v2236_v62  ;;  %v391_v53 = vshll.u32 %v4598_v10, %v2236_v62  ;;  %vm691_vm1 = vcmp.gt.s32.totalorder %v690_v20, 0 }
  0xbd   :  { %4735 = vst [vmem:[#allocation41_spill] sm:$0xff] %v2477_v18  ;;  %v385_v30 = vshll.u32 %v4596_v57, %v2236_v62  ;;  %v1414_v1 = vadd.s32 1, %v1949_v17  ;;  %v1953_v35 = vadd.s32 4294967169, %v1511_v51  ;;  %v891_v52 = vand.u32 2139095040, %v2461_v60 }
  0xbe   :  { %v4736_v4 = vand.u32 2147483647, %v2209_v25  ;;  %v390_v21 = vor.u32 %v389_v41, %v388_v16  ;;  %v393_v43 = vor.u32 %v392_v59, %v391_v53  ;;  %v2491_v57 = vsel %vm299_vm0, %v2473_v55, 920167782 }
  0xbf   :  { %v387_v13 = vor.u32 %v386_v11, %v385_v30  ;;  %4737 = vst [vmem:[#allocation42_spill] sm:$0xff] %v2491_v57  ;;  %v2495_v62 = vsel %vm299_vm0, %v295_v34, 1326507024  ;;  %v788_v17 = vshrl.u32 %v787_v42, 23  ;;  %v2497_v51 = vshrl.u32 %v588_v12, 5 }
  0xc0   :  { %v375_v3 = vand.u32 8388607, %v4736_v4  ;;  %4738 = vst [vmem:[#allocation43_spill] sm:$0xff] %v2495_v62  ;;  %v2500_v10 = vsub.s32 32, %v2477_v18  ;;  %v692_v23 = vsel %vm691_vm1, %v690_v20, 0  ;;  %v2503_v4 = vmul.f32 %v2203_v19, %v82_v58 }
  0xc1   :  { %4739 = vst [vmem:[#allocation44_spill] sm:$0xff] %v2497_v51  ;;  %vm1415_vm2 = vcmp.gt.s32.totalorder %v1414_v1, 0  ;;  %v892_v53 = vshrl.u32 %v891_v52, 23  ;;  %vm400_vm3 = vcmp.lt.s32.totalorder %v2242_v7, 1  ;;  %vm402_vm5 = vcmp.lt.s32.totalorder %v2242_v7, 3 }
  0xc2   :  { %4740 = vst [vmem:[#allocation45_spill] sm:$0xff] %v2500_v10  ;;  %v1517_v41 = vadd.s32 1, %v1953_v35  ;;  %v376_v16 = vor.u32 8388608, %v375_v3  ;;  %v408_v11 = vsel %vm400_vm3, %v387_v13, %v390_v21  ;;  %v410_v12 = vsel %vm402_vm5, %v393_v43, %v2309_v2 }
  0xc3   :  { %v2512_v59 = vand.u32 31, %v692_v23  ;;  %v1925_v20 = vadd.s32 4294967169, %v788_v17  ;;  %v412_v19 = vsel %vm400_vm3, %v390_v21, %v393_v43  ;;  %v414_v34 = vsel %vm402_vm5, %v2286_v48, %v2325_v37 }
  0xc4   :  { %v603_v3 = vshrl.u32 %v4727_v0, %v2500_v10  ;;  %v606_v42 = vshrl.u32 %v4719_v14, %v2500_v10  ;;  %v2525_v30 = vmul.f32 %v2206_v22, %v82_v58  ;;  %vm401_vm7 = vcmp.lt.s32.totalorder %v2242_v7, 2 }
  0xc5   :  { %4741 = vst [vmem:[#allocation46_spill] sm:$0xff] %v2512_v59  ;;  %v602_v2 = vshll.u32 %v4718_v47, %v2477_v18  ;;  %v605_v35 = vshll.u32 %v4727_v0, %v2477_v18  ;;  %vm611_vm8 = vcmp.lt.s32.totalorder %v2497_v51, 4  ;;  %v411_v48 = vsel %vm401_vm7, %v408_v11, %v410_v12 }
  0xc6   :  { %v2535_v37 = vshrl.u32 %v692_v23, 5  ;;  %v1416_v52 = vsel %vm1415_vm2, %v1414_v1, 0  ;;  %v415_v22 = vsel %vm401_vm7, %v412_v19, %v414_v34  ;;  %v2540_v58 = vshll.u32 %v376_v16, 8 }
  0xc7   :  { %v2543_v17 = vsub.s32 32, %v2512_v59  ;;  %vm1518_vm11 = vcmp.gt.s32.totalorder %v1517_v41, 0  ;;  %v794_v60 = vadd.s32 1, %v1925_v20  ;;  %v2545_v18 = vadd.s32 4294967169, %v892_v53 }
  0xc8   :  { %4742 = vst [vmem:[#allocation47_spill] sm:$0xff] %v2535_v37  ;;  %v2547_v10 = vor.u32 %v603_v3, %v602_v2  ;;  %v607_v55 = vor.u32 %v606_v42, %v605_v35  ;;  %v2550_v23 = vmul.u32.u64.low %v2540_v58, %v411_v48  ;;  %v2551_v11 = vmul.u32.u64.high %v2540_v58, %v411_v48, %v2550_v23 }
  0xc9   :  { %4743 = vst [vmem:[#allocation48_spill] sm:$0xff] %v2543_v17  ;;  %v706_v1 = vshll.u32 %v4718_v47, %v2512_v59  ;;  %v709_v16 = vshll.u32 %v4727_v0, %v2512_v59  ;;  %v2559_v12 = vmul.u32.u64.low %v2540_v58, %v415_v22  ;;  %v2560_v19 = vmul.u32.u64.high %v2540_v58, %v415_v22, %v2559_v12 }
  0xca   :  { %4744 = vst [vmem:[#allocation49_spill] sm:$0xff] %v2547_v10  ;;  %v405_v53 = vsel %vm403_vm4, %v393_v43, 2102212464  ;;  %v4745_v20 = vmov 2475754826   ;;  %v496_v2 = vshrl.u32 %v4718_v47, %v2261_v27  ;;  %v707_v35 = vshrl.u32 %v4727_v0, %v2543_v17 }
  0xcb   :  { %v490_v34 = vshrl.u32 %v4745_v20, %v2261_v27  ;;  %v4746_v3 = vmov 2131351028   ;;  %vm715_vm15 = vcmp.lt.s32.totalorder %v2535_v37, 4  ;;  %v2573_v48 = vshrl.u32 %v1416_v52, 5 }
  0xcc   :  { %v493_v42 = vshrl.u32 %v4746_v3, %v2261_v27  ;;  %v2575_v22 = vand.u32 31, %v1416_v52  ;;  %v4749_v43 = vmov 683565275   ;;  %v710_v59 = vshrl.u32 %v4719_v14, %v2543_v17 }
  0xcd   :  { %4747 = vst [vmem:[#allocation50_spill] sm:$0xff] %v2573_v48  ;;  %v384_v12 = vshrl.u32 %v4749_v43, %v2245_v8  ;;  %v489_v62 = vshll.u32 %v4749_v43, %v2240_v5  ;;  %v492_v57 = vshll.u32 %v4745_v20, %v2240_v5  ;;  %v495_v36 = vshll.u32 %v4746_v3, %v2240_v5 }
  0xce   :  { %4748 = vst [vmem:[#allocation51_spill] sm:$0xff] %v2575_v22  ;;  %v1519_v25 = vsel %vm1518_vm11, %v1517_v41, 0  ;;  %v406_v8 = vsel %vm402_vm5, %v390_v21, %v405_v53  ;;  %v4750_v63 = vand.u32 2147483647, %v2212_v28  ;;  %v2597_v29 = vsel %vm611_vm8, %v2547_v10, 920167782 }
  0xcf   :  { %v404_v52 = vsel %vm400_vm3, %v384_v12, %v387_v13  ;;  %4751 = vst [vmem:[#allocation52_spill] sm:$0xff] %v2597_v29  ;;  %v2599_v44 = vor.u32 %v490_v34, %v489_v62  ;;  %v2601_v24 = vor.u32 %v493_v42, %v492_v57  ;;  %v497_v5 = vor.u32 %v496_v2, %v495_v36  ;;  %v4808_v29 = vld [vmem:[#allocation24_spill] sm:$0xff] }
  0xd0   :  { %v479_v17 = vand.u32 8388607, %v4750_v63  ;;  %v2605_v41 = vsel %vm611_vm8, %v607_v55, 1326507024  ;;  %v2607_v13 = vor.u32 %v707_v35, %v706_v1  ;;  %v2610_v21 = vsub.s32 32, %v2575_v22 }
  0xd1   :  { %4752 = vst [vmem:[#allocation53_spill] sm:$0xff] %v2605_v41  ;;  %v1430_v63 = vshll.u32 %v4718_v47, %v2575_v22  ;;  %v711_v53 = vor.u32 %v710_v59, %v709_v16  ;;  %v2614_v12 = vand.u32 31, %v1519_v25  ;;  %v407_v57 = vsel %vm401_vm7, %v404_v52, %v406_v8 }
  0xd2   :  { %4753 = vst [vmem:[#allocation54_spill] sm:$0xff] %v2607_v13  ;;  %4754 = vst [vmem:[#allocation55_spill] sm:$0xff] %v2610_v21  ;;  %v426_v36 = vadd.s32 1, %v2551_v11  ;;  %vm425_vm4 = vc.u32 %v2560_v19, %v2550_v23  ;;  %v480_v55 = vor.u32 8388608, %v479_v17  ;;  %vm504_vm1 = vcmp.lt.s32.totalorder %v2258_v26, 1 }
  0xd3   :  { %4755 = vst [vmem:[#allocation56_spill] sm:$0xff] %v2614_v12  ;;  %vm506_vm2 = vcmp.lt.s32.totalorder %v2258_v26, 3  ;;  %v512_v62 = vsel %vm504_vm1, %v2599_v44, %v2601_v24  ;;  %v516_v59 = vsel %vm504_vm1, %v2601_v24, %v497_v5  ;;  %v1431_v1 = vshrl.u32 %v4727_v0, %v2610_v21 }
  0xd4   :  { %v514_v7 = vsel %vm506_vm2, %v497_v5, %v2330_v38  ;;  %v518_v17 = vsel %vm506_vm2, %v2300_v61, %v2338_v39  ;;  %v2641_v16 = vshll.u32 %v4727_v0, %v2575_v22  ;;  %v2645_v34 = vshrl.u32 %v4719_v14, %v2610_v21 }
  0xd5   :  { %vm795_vm3 = vcmp.gt.s32.totalorder %v794_v60, 0  ;;  %v2650_v38 = vsel %vm715_vm15, %v2607_v13, 920167782  ;;  %v2652_v42 = vshrl.u32 %v1519_v25, 5  ;;  %v427_v61 = vsel %vm425_vm4, %v426_v36, %v2551_v11 }
  0xd6   :  { %4756 = vst [vmem:[#allocation57_spill] sm:$0xff] %v2650_v38  ;;  %vm505_vm5 = vcmp.lt.s32.totalorder %v2258_v26, 2  ;;  %v2658_v39 = vsel %vm715_vm15, %v711_v53, 1326507024  ;;  %v423_v2 = vmul.u32 %v2540_v58, %v407_v57  ;;  %v2666_v8 = vsub.s32 32, %v2614_v12 }
  0xd7   :  { %4757 = vst [vmem:[#allocation58_spill] sm:$0xff] %v2652_v42  ;;  %4758 = vst [vmem:[#allocation59_spill] sm:$0xff] %v2658_v39  ;;  %v515_v35 = vsel %vm505_vm5, %v512_v62, %v514_v7  ;;  %v519_v52 = vsel %vm505_vm5, %v516_v59, %v518_v17  ;;  %v796_v25 = vsel %vm795_vm3, %v794_v60, 0  ;;  %v2668_v13 = vshll.u32 %v480_v55, 8 }
  0xd8   :  { %4759 = vst [vmem:[#allocation60_spill] sm:$0xff] %v2666_v8  ;;  %vm4653_vm7 = vcmp.lt.s32.totalorder %v2573_v48, 4  ;;  %v2672_v53 = vadd.s32 %v427_v61, %v423_v2  ;;  %v1216_v58 = vshrl.u32 %v4745_v20, %v2267_v33  ;;  %v1219_v57 = vshrl.u32 %v4746_v3, %v2267_v33 }
  0xd9   :  { %v1222_v36 = vshrl.u32 %v4718_v47, %v2267_v33  ;;  %v2681_v62 = vmul.u32.u64.low %v2668_v13, %v519_v52  ;;  %v2682_v60 = vmul.u32.u64.high %v2668_v13, %v519_v52, %v2681_v62  ;;  %v2689_v59 = vand.u32 31, %v796_v25 }
  0xda   :  { %v2685_v55 = vmul.u32.u64.low %v2668_v13, %v515_v35  ;;  %v2686_v7 = vmul.u32.u64.high %v2668_v13, %v515_v35, %v2685_v55  ;;  %v1215_v17 = vshll.u32 %v4749_v43, %v2247_v9  ;;  %v1218_v61 = vshll.u32 %v4745_v20, %v2247_v9 }
  0xdb   :  { %4760 = vst [vmem:[#allocation61_spill] sm:$0xff] %v2689_v59  ;;  %v1221_v2 = vshll.u32 %v4746_v3, %v2247_v9  ;;  %v2697_v11 = vor.u32 %v1431_v1, %v1430_v63  ;;  %v898_v52 = vadd.s32 1, %v2545_v18  ;;  %v488_v35 = vshrl.u32 %v4749_v43, %v2261_v27 }
  0xdc   :  { %v4762_v62 = vand.u32 2147483647, %v2216_v31  ;;  %v509_v38 = vsel %vm507_vm6, %v497_v5, 2102212464  ;;  %v2706_v22 = vor.u32 %v1216_v58, %v1215_v17  ;;  %v2708_v37 = vor.u32 %v1219_v57, %v1218_v61  ;;  %v50_v61 = vpop.permute.xlu1 %49 }
  0xdd   :  { %4761 = vst [vmem:[#allocation62_spill] sm:$0xff] %v2697_v11  ;;  %v1223_v21 = vor.u32 %v1222_v36, %v1221_v2  ;;  %v1435_v9 = vor.u32 %v2645_v34, %v2641_v16  ;;  %v1533_v18 = vshll.u32 %v4718_v47, %v2614_v12  ;;  %v1536_v27 = vshll.u32 %v4727_v0, %v2614_v12 }
  0xde   :  { %v1205_v39 = vand.u32 8388607, %v4762_v62  ;;  %v429_v63 = vadd.s32 536870912, %v2672_v53  ;;  %v1534_v1 = vshrl.u32 %v4727_v0, %v2666_v8  ;;  %v1537_v5 = vshrl.u32 %v4719_v14, %v2666_v8 }
  0xdf   :  { %v2722_v58 = vsub.s32 32, %v2689_v59  ;;  %v508_v16 = vsel %vm504_vm1, %v488_v35, %v2599_v44  ;;  %vm4652_vm6 = vcmp.lt.s32.totalorder %v2652_v42, 4  ;;  %v510_v34 = vsel %vm506_vm2, %v2601_v24, %v509_v38 }
  0xe0   :  { %v1206_v57 = vor.u32 8388608, %v1205_v39  ;;  %vm1230_vm11 = vcmp.lt.s32.totalorder %v2284_v46, 1  ;;  %vm1232_vm4 = vcmp.lt.s32.totalorder %v2284_v46, 3  ;;  %v2750_v38 = vsel %vm4653_vm7, %v2697_v11, 920167782 }
  0xe1   :  { %4763 = vst [vmem:[#allocation63_spill] sm:$0xff] %v2722_v58  ;;  %v1238_v36 = vsel %vm1230_vm11, %v2706_v22, %v2708_v37  ;;  %v1240_v44 = vsel %vm1232_vm4, %v1223_v21, %v2348_v45  ;;  %v1242_v17 = vsel %vm1230_vm11, %v2708_v37, %v1223_v21  ;;  %v1244_v24 = vsel %vm1232_vm4, %v2311_v6, %v2352_v49 }
  0xe2   :  { %4764 = vst [vmem:[#allocation64_spill] sm:$0xff] %v2750_v38  ;;  %v2752_v39 = vshrl.u32 %v796_v25, 5  ;;  %v2754_v2 = vshrl.u32 %v429_v63, 30  ;;  %v530_v45 = vadd.s32 1, %v2686_v7  ;;  %vm899_vm1 = vcmp.gt.s32.totalorder %v898_v52, 0 }
  0xe3   :  { %v511_v35 = vsel %vm505_vm5, %v508_v16, %v510_v34  ;;  %vm529_vm2 = vc.u32 %v2682_v60, %v2685_v55  ;;  %vm1231_vm3 = vcmp.lt.s32.totalorder %v2284_v46, 2  ;;  %v2762_v6 = vor.u32 %v1534_v1, %v1533_v18 }
  0xe4   :  { %4765 = vst [vmem:[#allocation65_spill] sm:$0xff] %v2752_v39  ;;  %v1538_v49 = vor.u32 %v1537_v5, %v1536_v27  ;;  %v1241_v25 = vsel %vm1231_vm3, %v1238_v36, %v1240_v44  ;;  %v1245_v62 = vsel %vm1231_vm3, %v1242_v17, %v1244_v24  ;;  %v811_v63 = vshrl.u32 %v4727_v0, %v2722_v58 }
  0xe5   :  { %4766 = vst [vmem:[#allocation66_spill] sm:$0xff] %v2762_v6  ;;  %v814_v26 = vshrl.u32 %v4719_v14, %v2722_v58  ;;  %v2773_v16 = vadd.f32 %v2503_v4, %v50_v61  ;;  %v2775_v34 = vshll.u32 %v1206_v57, 8  ;;  %v900_v18 = vsel %vm899_vm1, %v898_v52, 0 }
  0xe6   :  { %v431_v27 = vshll.u32 %v2754_v2, 30  ;;  %v527_v1 = vmul.u32 %v2668_v13, %v511_v35  ;;  %v531_v5 = vsel %vm529_vm2, %v530_v45, %v2686_v7  ;;  %v2791_v4 = vsel %vm4653_vm7, %v1435_v9, 1326507024 }
  0xe7   :  { %4767 = vst [vmem:[#allocation67_spill] sm:$0xff] %v2773_v16  ;;  %v2781_v36 = vmul.u32.u64.low %v2775_v34, %v1245_v62  ;;  %v2782_v44 = vmul.u32.u64.high %v2775_v34, %v1245_v62, %v2781_v36  ;;  %v2785_v17 = vmul.u32.u64.low %v2775_v34, %v1241_v25  ;;  %v2786_v24 = vmul.u32.u64.high %v2775_v34, %v1241_v25, %v2785_v17  ;;  %4768 = vst [vmem:[#allocation68_spill] sm:$0xff] %v2791_v4 }
  0xe8   :  { %v810_v52 = vshll.u32 %v4718_v47, %v2689_v59  ;;  %v813_v13 = vshll.u32 %v4727_v0, %v2689_v59  ;;  %vm4651_vm5 = vcmp.lt.s32.totalorder %v2752_v39, 4  ;;  %v2801_v7 = vsel %vm4652_vm6, %v2762_v6, 920167782 }
  0xe9   :  { %4769 = vst [vmem:[#allocation69_spill] sm:$0xff] %v2801_v7  ;;  %v2804_v57 = vadd.f32 %v2525_v30, %v50_v61  ;;  %v1613_v45 = vand.u32 2139095040, %v2773_v16  ;;  %v2807_v9 = vadd.s32 %v531_v5, %v527_v1  ;;  %v2811_v35 = vsel %vm4652_vm6, %v1538_v49, 1326507024 }
  0xea   :  { %4771 = vst [vmem:[#allocation71_spill] sm:$0xff] %v2811_v35  ;;  %v2813_v25 = vor.u32 %v811_v63, %v810_v52  ;;  %v2815_v62 = vshrl.u32 %v900_v18, 5  ;;  %v2817_v36 = vand.u32 31, %v900_v18  ;;  %v815_v59 = vor.u32 %v814_v26, %v813_v13 }
  0xeb   :  { %4770 = vst [vmem:[#allocation70_spill] sm:$0xff] %v2804_v57  ;;  %v2820_v58 = vsub.s32 %v2672_v53, %v431_v27  ;;  %v1214_v30 = vshrl.u32 %v4749_v43, %v2267_v33  ;;  %v1235_v61 = vsel %vm1233_vm9, %v1223_v21, 2102212464  ;;  %v1319_v49 = vshrl.u32 %v4745_v20, %v2276_v40 }
  0xec   :  { %4772 = vst [vmem:[#allocation72_spill] sm:$0xff] %v2813_v25  ;;  %4773 = vst [vmem:[#allocation73_spill] sm:$0xff] %v2815_v62  ;;  %v1322_v63 = vshrl.u32 %v4746_v3, %v2276_v40  ;;  %v1325_v26 = vshrl.u32 %v4718_v47, %v2276_v40  ;;  %v1614_v18 = vshrl.u32 %v1613_v45, 23  ;;  %v1716_v53 = vand.u32 2139095040, %v2804_v57 }
  0xed   :  { %4774 = vst [vmem:[#allocation74_spill] sm:$0xff] %v2817_v36  ;;  %v533_v27 = vadd.s32 536870912, %v2807_v9  ;;  %v1234_v33 = vsel %vm1230_vm11, %v1214_v30, %v2706_v22  ;;  %v1236_v21 = vsel %vm1232_vm4, %v2708_v37, %v1235_v61  ;;  %v1318_v5 = vshll.u32 %v4749_v43, %v2250_v15 }
  0xee   :  { %v1321_v52 = vshll.u32 %v4745_v20, %v2250_v15  ;;  %v1324_v13 = vshll.u32 %v4746_v3, %v2250_v15  ;;  %v2848_v45 = vsub.s32 32, %v2817_v36  ;;  %v434_v1 = vsub.s32 0, %v2820_v58 }
  0xef   :  { %vm1255_vm9 = vc.u32 %v2782_v44, %v2785_v17  ;;  %v1256_v22 = vadd.s32 1, %v2786_v24  ;;  %v4776_v37 = vand.u32 2147483647, %v2218_v32  ;;  %v2856_v61 = vor.u32 %v1319_v49, %v1318_v5 }
  0xf0   :  { %4775 = vst [vmem:[#allocation75_spill] sm:$0xff] %v2848_v45  ;;  %v2858_v57 = vor.u32 %v1322_v63, %v1321_v52  ;;  %v1326_v16 = vor.u32 %v1325_v26, %v1324_v13  ;;  %v2863_v15 = vsel %vm4651_vm5, %v2813_v25, 920167782  ;;  %v914_v6 = vshll.u32 %v4718_v47, %v2817_v36  ;;  %v4782_v25 = vld [vmem:[#allocation13_spill] sm:$0xff] }
  0xf1   :  { %v1308_v30 = vand.u32 8388607, %v4776_v37  ;;  %4777 = vst [vmem:[#allocation76_spill] sm:$0xff] %v2863_v15  ;;  %v2869_v35 = vshll.u32 %v4727_v0, %v2817_v36  ;;  %v1237_v37 = vsel %vm1231_vm3, %v1234_v33, %v1236_v21  ;;  %v2875_v49 = vsel %vm4651_vm5, %v815_v59, 1326507024  ;;  %v4781_v33 = vld [vmem:[#allocation16_spill] sm:$0xff] }
  0xf2   :  { %4778 = vst [vmem:[#allocation77_spill] sm:$0xff] %v2875_v49  ;;  %v1957_v63 = vadd.s32 4294967169, %v1614_v18  ;;  %v1717_v26 = vshrl.u32 %v1716_v53, 23  ;;  %v2877_v5 = vshrl.u32 %v533_v27, 30  ;;  %v1910_v52 = vmin.u32 %v434_v1, %v2820_v58  ;;  %v4779_v1 = vld [vmem:[#allocation14_spill] sm:$0xff] }
  0xf3   :  { %v1257_v13 = vsel %vm1255_vm9, %v1256_v22, %v2786_v24  ;;  %vm1333_vm11 = vcmp.lt.s32.totalorder %v2292_v54, 1  ;;  %vm1335_vm4 = vcmp.lt.s32.totalorder %v2292_v54, 3  ;;  %v1253_v36 = vmul.u32 %v2775_v34, %v1237_v37  ;;  %v4780_v34 = vld [vmem:[#allocation8_spill] sm:$0xff] }
  0xf4   :  { %v1309_v46 = vor.u32 8388608, %v1308_v30  ;;  %v1341_v59 = vsel %vm1333_vm11, %v2856_v61, %v2858_v57  ;;  %v1343_v18 = vsel %vm1335_vm4, %v1326_v16, %v2359_v56  ;;  %v1345_v24 = vsel %vm1333_vm11, %v2858_v57, %v1326_v16 }
  0xf5   :  { %v1347_v53 = vsel %vm1335_vm4, %v4779_v1, %v2411_v50  ;;  %v1013_v21 = vshrl.u32 %v4746_v3, %v4781_v33  ;;  %v535_v22 = vshll.u32 %v2877_v5, 30  ;;  %v2902_v30 = vadd.s32 %v1257_v13, %v1253_v36 }
  0xf6   :  { %v1010_v56 = vshrl.u32 %v4745_v20, %v4781_v33  ;;  %v1016_v37 = vshrl.u32 %v4718_v47, %v4781_v33  ;;  %v1961_v15 = vadd.s32 4294967169, %v1717_v26  ;;  %vm1334_vm1 = vcmp.lt.s32.totalorder %v2292_v54, 2 }
  0xf7   :  { %v1012_v50 = vshll.u32 %v4745_v20, %v4782_v25  ;;  %v1015_v1 = vshll.u32 %v4746_v3, %v4782_v25  ;;  %v436_v27 = vclz %v1910_v52  ;;  %v1344_v36 = vsel %vm1334_vm1, %v1341_v59, %v1343_v18 }
  0xf8   :  { %v1348_v13 = vsel %vm1334_vm1, %v1345_v24, %v1347_v53  ;;  %v1009_v49 = vshll.u32 %v4749_v43, %v4782_v25  ;;  %v2919_v39 = vshll.u32 %v1309_v46, 8  ;;  %v4783_v26 = vand.u32 2147483647, %v4780_v34 }
  0xf9   :  { %v1014_v42 = vor.u32 %v1013_v21, %v1012_v50  ;;  %v1017_v12 = vor.u32 %v1016_v37, %v1015_v1  ;;  %v915_v8 = vshrl.u32 %v4727_v0, %v2848_v45  ;;  %v2926_v52 = vsub.s32 %v2807_v9, %v535_v22  ;;  %v4784_v37 = vld [vmem:[#allocation20_spill] sm:$0xff] }
  0xfa   :  { %v999_v7 = vand.u32 8388607, %v4783_v26  ;;  %v1259_v59 = vadd.s32 536870912, %v2902_v30  ;;  %v1011_v18 = vor.u32 %v1010_v56, %v1009_v49  ;;  %v1620_v24 = vadd.s32 1, %v1957_v63  ;;  %v4786_v63 = vld [vmem:[#allocation25_spill] sm:$0xff] }
  0xfb   :  { %v2929_v53 = vadd.s32 1, %v1961_v15  ;;  %v2932_v25 = vmul.u32.u64.low %v2919_v39, %v1348_v13  ;;  %v2933_v46 = vmul.u32.u64.high %v2919_v39, %v1348_v13, %v2932_v25  ;;  %vm1024_vm2 = vcmp.lt.s32.totalorder %v4784_v37, 1  ;;  %v4785_v15 = vld [vmem:[#allocation31_spill] sm:$0xff]  ;;  %v4787_v13 = vld [vmem:[#allocation28_spill] sm:$0xff] }
  0xfc   :  { %v2936_v26 = vmul.u32.u64.low %v2919_v39, %v1344_v36  ;;  %v2937_v21 = vmul.u32.u64.high %v2919_v39, %v1344_v36, %v2936_v26  ;;  %vm1026_vm3 = vcmp.lt.s32.totalorder %v4784_v37, 3  ;;  %v1911_v9 = vadd.s32 4294967294, %v436_v27 }
  0xfd   :  { %v1000_v22 = vor.u32 8388608, %v999_v7  ;;  %v1036_v49 = vsel %vm1024_vm2, %v1014_v42, %v1017_v12  ;;  %v1038_v56 = vsel %vm1026_vm3, %v4786_v63, %v4785_v15  ;;  %v538_v50 = vsub.s32 0, %v2926_v52 }
  0xfe   :  { %v2949_v1 = vshrl.u32 %v1259_v59, 30  ;;  %v1032_v36 = vsel %vm1024_vm2, %v1011_v18, %v1014_v42  ;;  %v1034_v27 = vsel %vm1026_vm3, %v1017_v12, %v4787_v13  ;;  %v2956_v7 = vor.u32 %v915_v8, %v914_v6 }
  0xff   :  { %v2960_v25 = vshrl.u32 %v4719_v14, %v2848_v45  ;;  %v1338_v15 = vsel %vm1336_vm10, %v1326_v16, 2102212464  ;;  %vm1025_vm9 = vcmp.lt.s32.totalorder %v4784_v37, 2  ;;  %vm1621_vm5 = vcmp.gt.s32.totalorder %v1620_v24, 0 }
 0x100   :  { %4788 = vst [vmem:[#allocation14_spill] sm:$0xff] %v2956_v7  ;;  %v1317_v59 = vshrl.u32 %v4749_v43, %v2276_v40  ;;  %v1029_v63 = vsel %vm1027_vm12, %v1017_v12, 2102212464  ;;  %v1039_v8 = vsel %vm1025_vm9, %v1036_v49, %v1038_v56  ;;  %vm1724_vm6 = vcmp.gt.s32.totalorder %v2929_v53, 0 }
 0x101   :  { %vm1912_vm7 = vcmp.lt.s32.totalorder %v1911_v9, 0  ;;  %v1008_v6 = vshrl.u32 %v4749_v43, %v4781_v33  ;;  %v1035_v16 = vsel %vm1025_vm9, %v1032_v36, %v1034_v27  ;;  %v1040_v13 = vshll.u32 %v1000_v22, 8 }
 0x102   :  { %v1914_v45 = vmin.u32 %v538_v50, %v2926_v52  ;;  %v1261_v40 = vshll.u32 %v2949_v1, 30  ;;  %v1337_v12 = vsel %vm1333_vm11, %v1317_v59, %v2856_v61  ;;  %v1339_v49 = vsel %vm1335_vm4, %v2858_v57, %v1338_v15 }
 0x103   :  { %vm923_vm10 = vcmp.lt.s32.totalorder %v2815_v62, 4  ;;  %v1028_v33 = vsel %vm1024_vm2, %v1008_v6, %v1011_v18  ;;  %v1030_v22 = vsel %vm1026_vm3, %v1014_v42, %v1029_v63  ;;  %v1622_v36 = vsel %vm1621_vm5, %v1620_v24, 0  ;;  %v4789_v42 = vld [vmem:[#allocation9_spill] sm:$0xff]  ;;  %v4790_v24 = vld [vmem:[#allocation19_spill] sm:$0xff] }
 0x104   :  { %v2989_v56 = vmul.u32.u64.low %v1040_v13, %v1039_v8  ;;  %v2990_v50 = vmul.u32.u64.high %v1040_v13, %v1039_v8, %v2989_v56  ;;  %v2993_v27 = vsel %vm1912_vm7, 0, %v1911_v9  ;;  %v1340_v57 = vsel %vm1334_vm1, %v1337_v12, %v1339_v49  ;;  %v4791_v49 = vld [vmem:[#allocation15_spill] sm:$0xff] }
 0x105   :  { %v2995_v61 = vmul.u32.u64.low %v1040_v13, %v1035_v16  ;;  %v2996_v59 = vmul.u32.u64.high %v1040_v13, %v1035_v16, %v2995_v61  ;;  %vm1358_vm12 = vc.u32 %v2933_v46, %v2936_v26  ;;  %v1359_v18 = vadd.s32 1, %v2937_v21 }
 0x106   :  { %v1031_v63 = vsel %vm1025_vm9, %v1028_v33, %v1030_v22  ;;  %v1113_v9 = vshrl.u32 %v4745_v20, %v4790_v24  ;;  %v1116_v8 = vshrl.u32 %v4746_v3, %v4790_v24  ;;  %v1119_v54 = vshrl.u32 %v4718_v47, %v4790_v24 }
 0x107   :  { %v444_v6 = vsub.s32 4294967266, %v2993_v27  ;;  %v540_v16 = vclz %v1914_v45  ;;  %v3015_v12 = vsub.s32 %v2902_v30, %v1261_v40  ;;  %v1112_v56 = vshll.u32 %v4749_v43, %v4791_v49 }
 0x108   :  { %vm1049_vm7 = vc.u32 %v2990_v50, %v2995_v61  ;;  %v1050_v37 = vadd.s32 1, %v2996_v59  ;;  %v1115_v33 = vshll.u32 %v4745_v20, %v4791_v49  ;;  %v1118_v22 = vshll.u32 %v4746_v3, %v4791_v49 }
 0x109   :  { %v1356_v15 = vmul.u32 %v2919_v39, %v1340_v57  ;;  %v1360_v45 = vsel %vm1358_vm12, %v1359_v18, %v2937_v21  ;;  %v1047_v30 = vmul.u32 %v1040_v13, %v1031_v63  ;;  %v4792_v40 = vand.u32 2147483647, %v4789_v42 }
 0x10a   :  { %v1051_v4 = vsel %vm1049_vm7, %v1050_v37, %v2996_v59  ;;  %v1114_v38 = vor.u32 %v1113_v9, %v1112_v56  ;;  %v1117_v48 = vor.u32 %v1116_v8, %v1115_v33  ;;  %v1120_v10 = vor.u32 %v1119_v54, %v1118_v22  ;;  %v4796_v8 = vld [vmem:[#allocation35_spill] sm:$0xff]  ;;  %v4799_v37 = vld [vmem:[#allocation36_spill] sm:$0xff]  ;;  %v4800_v33 = vld [vmem:[#allocation29_spill] sm:$0xff] }
 0x10b   :  { %v1102_v11 = vand.u32 8388607, %v4792_v40  ;;  %v919_v41 = vor.u32 %v2960_v25, %v2869_v35  ;;  %v1915_v49 = vadd.s32 4294967294, %v540_v16  ;;  %v1264_v39 = vsub.s32 0, %v3015_v12  ;;  %v4795_v35 = vld [vmem:[#allocation21_spill] sm:$0xff] }
 0x10c   :  { %v1052_v57 = vadd.s32 %v1051_v4, %v1047_v30  ;;  %v3040_v21 = vsel %vm923_vm10, %v2956_v7, 920167782  ;;  %v3042_v13 = vand.u32 31, %v1622_v36  ;;  %v1725_v59 = vsel %vm1724_vm6, %v2929_v53, 0 }
 0x10d   :  { %4793 = vst [vmem:[#allocation8_spill] sm:$0xff] %v3040_v21  ;;  %v3047_v18 = vadd.s32 %v1360_v45, %v1356_v15  ;;  %v1103_v9 = vor.u32 8388608, %v1102_v11  ;;  %vm1127_vm5 = vcmp.lt.s32.totalorder %v4795_v35, 1  ;;  %vm1129_vm11 = vcmp.lt.s32.totalorder %v4795_v35, 3 }
 0x10e   :  { %4794 = vst [vmem:[#allocation16_spill] sm:$0xff] %v3042_v13  ;;  %v1053_v63 = vadd.s32 536870912, %v1052_v57  ;;  %v445_v4 = vadd.s32 127, %v444_v6  ;;  %v1135_v25 = vsel %vm1127_vm5, %v1114_v38, %v1117_v48  ;;  %v1137_v54 = vsel %vm1129_vm11, %v1120_v10, %v4796_v8 }
 0x10f   :  { %v1139_v16 = vsel %vm1127_vm5, %v1117_v48, %v1120_v10  ;;  %v3060_v53 = vsel %vm923_vm10, %v919_v41, 1326507024  ;;  %v3062_v11 = vshrl.u32 %v1622_v36, 5  ;;  %vm1916_vm6 = vcmp.lt.s32.totalorder %v1915_v49, 0 }
 0x110   :  { %4797 = vst [vmem:[#allocation13_spill] sm:$0xff] %v3060_v53  ;;  %v1942_v15 = vmin.u32 %v1264_v39, %v3015_v12  ;;  %v1362_v6 = vadd.s32 536870912, %v3047_v18  ;;  %v3066_v56 = vshrl.u32 %v1053_v63, 30  ;;  %vm1128_vm4 = vcmp.lt.s32.totalorder %v4795_v35, 2 }
 0x111   :  { %v1141_v22 = vsel %vm1129_vm11, %v4800_v33, %v4799_v37  ;;  %v3073_v45 = vshrl.u32 %v1725_v59, 5  ;;  %v1138_v41 = vsel %vm1128_vm4, %v1135_v25, %v1137_v54  ;;  %v3079_v30 = vshll.u32 %v1103_v9, 8 }
 0x112   :  { %4798 = vst [vmem:[#allocation20_spill] sm:$0xff] %v3066_v56  ;;  %v1142_v36 = vsel %vm1128_vm4, %v1139_v16, %v1141_v22  ;;  %v3082_v40 = vsub.s32 32, %v3042_v13  ;;  %v3084_v39 = vand.u32 31, %v1725_v59  ;;  %v440_v63 = vsub.s32 32, %v2993_v27 }
 0x113   :  { %v446_v8 = vshll.u32 %v445_v4, 23  ;;  %v3087_v21 = vsel %vm1916_vm6, 0, %v1915_v49  ;;  %v1266_v37 = vclz %v1942_v15  ;;  %v3093_v25 = vshrl.u32 %v1362_v6, 30  ;;  %v4804_v15 = vld [vmem:[#allocation10_spill] sm:$0xff] }
 0x114   :  { %4801 = vst [vmem:[#allocation31_spill] sm:$0xff] %v3084_v39  ;;  %v3090_v33 = vmul.u32.u64.low %v3079_v30, %v1142_v36  ;;  %v3091_v7 = vmul.u32.u64.high %v3079_v30, %v1142_v36, %v3090_v33  ;;  %v1055_v9 = vshll.u32 %v3066_v56, 30  ;;  %v3103_v59 = vshll.u32 %v4718_v47, %v3042_v13 }
 0x115   :  { %v3097_v54 = vmul.u32.u64.low %v3079_v30, %v1138_v41  ;;  %v3098_v16 = vmul.u32.u64.high %v3079_v30, %v1138_v41, %v3097_v54  ;;  %v424_v49 = vadd.s32 %v2550_v23, %v2560_v19  ;;  %v1132_v4 = vsel %vm1130_vm13, %v1120_v10, 2102212464 }
 0x116   :  { %4802 = vst [vmem:[#allocation25_spill] sm:$0xff] %v3091_v7  ;;  %v3112_v22 = vshll.u32 %v4727_v0, %v3042_v13  ;;  %v441_v41 = vshll.u32 %v2820_v58, %v2993_v27  ;;  %v528_v36 = vadd.s32 %v2685_v55, %v2682_v60  ;;  %v1111_v33 = vshrl.u32 %v4749_v43, %v4790_v24  ;;  %v4806_v27 = vld [vmem:[#allocation17_spill] sm:$0xff] }
 0x117   :  { %4803 = vst [vmem:[#allocation28_spill] sm:$0xff] %v3097_v54  ;;  %v442_v53 = vshrl.u32 %v424_v49, %v440_v63  ;;  %v447_v23 = vor.u32 4788187, %v446_v8  ;;  %v548_v19 = vsub.s32 4294967266, %v3087_v21  ;;  %v1943_v10 = vadd.s32 4294967294, %v1266_v37  ;;  %v4807_v63 = vld [vmem:[#allocation22_spill] sm:$0xff] }
 0x118   :  { %v1364_v6 = vshll.u32 %v3093_v25, 30  ;;  %v3122_v62 = vsub.s32 %v1052_v57, %v1055_v9  ;;  %v1131_v13 = vsel %vm1127_vm5, %v1111_v33, %v1114_v38  ;;  %v1133_v58 = vsel %vm1129_vm11, %v1117_v48, %v1132_v4 }
 0x119   :  { %v4805_v60 = vand.u32 2147483647, %v4804_v15  ;;  %v177_v24 = vshll.u32 %v4749_v43, %v4806_v27  ;;  %v178_v8 = vshrl.u32 %v4745_v20, %v4807_v63  ;;  %v180_v37 = vshll.u32 %v4745_v20, %v4806_v27 }
 0x11a   :  { %v1153_v57 = vadd.s32 1, %v3098_v16  ;;  %v181_v38 = vshrl.u32 %v4746_v3, %v4807_v63  ;;  %v183_v48 = vshll.u32 %v4746_v3, %v4806_v27  ;;  %v184_v9 = vshrl.u32 %v4718_v47, %v4807_v63 }
 0x11b   :  { %v167_v55 = vand.u32 8388607, %v4805_v60  ;;  %v443_v49 = vor.u32 %v442_v53, %v441_v41  ;;  %v549_v4 = vadd.s32 127, %v548_v19  ;;  %v1134_v33 = vsel %vm1128_vm4, %v1131_v13, %v1133_v58  ;;  %v4809_v58 = vld [vmem:[#allocation39_spill] sm:$0xff] }
 0x11c   :  { %vm1152_vm13 = vc.u32 %v3091_v7, %v3097_v54  ;;  %v179_v60 = vor.u32 %v178_v8, %v177_v24  ;;  %v182_v42 = vor.u32 %v181_v38, %v180_v37  ;;  %v185_v15 = vor.u32 %v184_v9, %v183_v48  ;;  %v4811_v8 = vld [vmem:[#allocation37_spill] sm:$0xff]  ;;  %v4812_v48 = vld [vmem:[#allocation6_spill] sm:$0xff] }
 0x11d   :  { %vm194_vm1 = vcmp.lt.s32.totalorder %v4808_v29, 3  ;;  %v448_v51 = vand.u32 2147483647, %v447_v23  ;;  %v544_v56 = vsub.s32 32, %v3087_v21  ;;  %v3150_v27 = vsub.s32 %v3047_v18, %v1364_v6  ;;  %v4810_v23 = vld [vmem:[#allocation32_spill] sm:$0xff] }
 0x11e   :  { %vm192_vm2 = vcmp.lt.s32.totalorder %v4808_v29, 1  ;;  %vm1944_vm3 = vcmp.lt.s32.totalorder %v1943_v10, 0  ;;  %v1058_v35 = vsub.s32 0, %v3122_v62  ;;  %v1154_v13 = vsel %vm1152_vm13, %v1153_v57, %v3098_v16 }
 0x11f   :  { %v168_v53 = vor.u32 8388608, %v167_v55  ;;  %v550_v41 = vshll.u32 %v549_v4, 23  ;;  %v1150_v19 = vmul.u32 %v3079_v30, %v1134_v33  ;;  %vm193_vm9 = vcmp.lt.s32.totalorder %v4808_v29, 2 }
 0x120   :  { %v206_v24 = vsel %vm194_vm1, %v4810_v23, %v4809_v58  ;;  %v450_v18 = vcvt.s32.f32 %v443_v49  ;;  %v200_v6 = vsel %vm192_vm2, %v179_v60, %v182_v42  ;;  %v202_v37 = vsel %vm194_vm1, %v185_v15, %v4811_v8 }
 0x121   :  { %v204_v16 = vsel %vm192_vm2, %v182_v42, %v185_v15  ;;  %v545_v30 = vshll.u32 %v2926_v52, %v3087_v21  ;;  %v3170_v55 = vsel %vm1944_vm3, 0, %v1943_v10  ;;  %v1367_v57 = vsub.s32 0, %v3150_v27 }
 0x122   :  { %v3173_v38 = vadd.s32 %v1154_v13, %v1150_v19  ;;  %vm370_vm12 = vcmp.lt.s32.totalorder %v4812_v48, 0  ;;  %v546_v9 = vshrl.u32 %v528_v36, %v544_v56  ;;  %v1934_v49 = vmin.u32 %v1058_v35, %v3122_v62 }
 0x123   :  { %v207_v4 = vsel %vm193_vm9, %v204_v16, %v206_v24  ;;  %v208_v33 = vshll.u32 %v168_v53, 8  ;;  %v451_v58 = vmul.f32 %v450_v18, %v448_v51  ;;  %v551_v23 = vor.u32 4788187, %v550_v41 }
 0x124   :  { %v176_v52 = vshrl.u32 %v4749_v43, %v4807_v63  ;;  %v203_v21 = vsel %vm193_vm9, %v200_v6, %v202_v37  ;;  %v1274_v10 = vsub.s32 4294967266, %v3170_v55  ;;  %v197_v13 = vsel %vm195_vm14, %v185_v15, 2102212464 }
 0x125   :  { %v3186_v56 = vmul.u32.u64.low %v208_v33, %v207_v4  ;;  %v3187_v36 = vmul.u32.u64.high %v208_v33, %v207_v4, %v3186_v56  ;;  %v3190_v35 = vsub.s32 32, %v3084_v39  ;;  %v1739_v51 = vshll.u32 %v4718_v47, %v3084_v39 }
 0x126   :  { %v1946_v53 = vmin.u32 %v1367_v57, %v3150_v27  ;;  %v1156_v63 = vadd.s32 536870912, %v3173_v38  ;;  %vm1645_vm7 = vcmp.lt.s32.totalorder %v3062_v11, 4  ;;  %v547_v41 = vor.u32 %v546_v9, %v545_v30 }
 0x127   :  { %4813 = vst [vmem:[#allocation19_spill] sm:$0xff] %v3190_v35  ;;  %v1060_v19 = vclz %v1934_v49  ;;  %v3197_v24 = vmul.u32.u64.low %v208_v33, %v203_v21  ;;  %v3198_v18 = vmul.u32.u64.high %v208_v33, %v203_v21, %v3197_v24  ;;  %v1637_v15 = vshrl.u32 %v4727_v0, %v3082_v40 }
 0x128   :  { %v4814_v6 = vand.u32 2147483647, %v4812_v48  ;;  %v454_v37 = vsub.s32 4, %v2754_v2  ;;  %v196_v16 = vsel %vm192_vm2, %v176_v52, %v179_v60  ;;  %v198_v30 = vsel %vm194_vm1, %v182_v42, %v197_v13 }
 0x129   :  { %v1640_v57 = vshrl.u32 %v4719_v14, %v3082_v40  ;;  %v452_v9 = vxor.u32 2147483648, %v451_v58  ;;  %v552_v49 = vand.u32 2147483647, %v551_v23  ;;  %v1275_v4 = vadd.s32 127, %v1274_v10 }
 0x12a   :  { %vm3205_vm14 = vcmp.le.f32.partialorder %v4814_v6, 0.7853982  ;;  %v1270_v21 = vsub.s32 32, %v3170_v55  ;;  %v1369_v56 = vclz %v1946_v53  ;;  %v3217_v6 = vshrl.u32 %v1156_v63, 30 }
 0x12b   :  { %vm217_vm5 = vc.u32 %v3187_v36, %v3197_v24  ;;  %v554_v54 = vcvt.s32.f32 %v547_v41  ;;  %v1935_v7 = vadd.s32 4294967294, %v1060_v19  ;;  %v199_v60 = vsel %vm193_vm9, %v196_v16, %v198_v30 }
 0x12c   :  { %v218_v42 = vadd.s32 1, %v3198_v18  ;;  %v3225_v52 = vor.u32 %v1637_v15, %v3103_v59  ;;  %v1740_v23 = vshrl.u32 %v4727_v0, %v3190_v35  ;;  %v455_v10 = vsel %vm370_vm12, %v454_v37, %v2754_v2 }
 0x12d   :  { %v1254_v13 = vadd.s32 %v2785_v17, %v2782_v44  ;;  %vm474_vm11 = vcmp.lt.s32.totalorder %v2212_v28, 0  ;;  %v453_v29 = vsel %vm370_vm12, %v452_v9, %v451_v58  ;;  %v555_v53 = vmul.f32 %v554_v54, %v552_v49  ;;  %v4821_v9 = vld [vmem:[#allocation26_spill] sm:$0xff] }
 0x12e   :  { %4817 = vst [vmem:[#allocation15_spill] sm:$0xff] %v3225_v52  ;;  %v1276_v63 = vshll.u32 %v1275_v4, 23  ;;  %v219_v59 = vsel %vm217_vm5, %v218_v42, %v3198_v18  ;;  %v1947_v19 = vadd.s32 4294967294, %v1369_v56  ;;  %v1158_v15 = vshll.u32 %v3217_v6, 30  ;;  %v4822_v4 = vld [vmem:[#allocation30_spill] sm:$0xff] }
 0x12f   :  { %v1272_v41 = vshrl.u32 %v1254_v13, %v1270_v21  ;;  %v215_v16 = vmul.u32 %v208_v33, %v199_v60  ;;  %v1641_v30 = vor.u32 %v1640_v57, %v3112_v22  ;;  %v3242_v2 = vshll.u32 %v4727_v0, %v3084_v39 }
 0x130   :  { %v3246_v44 = vshrl.u32 %v4719_v14, %v3190_v35  ;;  %vm1936_vm6 = vcmp.lt.s32.totalorder %v1935_v7, 0  ;;  %v3251_v17 = vsel %vm1645_vm7, %v3225_v52, 920167782  ;;  %v3253_v54 = vor.u32 %v1740_v23, %v1739_v51 }
 0x131   :  { %4818 = vst [vmem:[#allocation21_spill] sm:$0xff] %v3251_v17  ;;  %v1271_v33 = vshll.u32 %v3015_v12, %v3170_v55  ;;  %v3257_v22 = vadd.s32 %v219_v59, %v215_v16  ;;  %vm1748_vm4 = vcmp.lt.s32.totalorder %v3073_v45, 4  ;;  %v456_v14 = vsel %vm3205_vm14, %v4812_v48, %v453_v29  ;;  %v4820_v12 = vld [vmem:[#allocation11_spill] sm:$0xff] }
 0x132   :  { %4819 = vst [vmem:[#allocation35_spill] sm:$0xff] %v3253_v54  ;;  %v457_v0 = vsel %vm3205_vm14, 0, %v455_v10  ;;  %v556_v58 = vxor.u32 2147483648, %v555_v53  ;;  %v1277_v18 = vor.u32 4788187, %v1276_v63  ;;  %vm1948_vm13 = vcmp.lt.s32.totalorder %v1947_v19, 0 }
 0x133   :  { %v1273_v37 = vor.u32 %v1272_v41, %v1271_v33  ;;  %v3265_v51 = vsel %vm1936_vm6, 0, %v1935_v7  ;;  %v3268_v57 = vsub.s32 %v3173_v38, %v1158_v15  ;;  %v4673_v55 = vand.u32 2147483647, %v4820_v12 }
 0x134   :  { %v281_v49 = vshll.u32 %v4749_v43, %v4821_v9  ;;  %v282_v21 = vshrl.u32 %v4745_v20, %v4822_v4  ;;  %v284_v8 = vshll.u32 %v4745_v20, %v4821_v9  ;;  %v221_v56 = vadd.s32 536870912, %v3257_v22 }
 0x135   :  { %v285_v7 = vshrl.u32 %v4746_v3, %v4822_v4  ;;  %v287_v38 = vshll.u32 %v4746_v3, %v4821_v9  ;;  %v288_v60 = vshrl.u32 %v4718_v47, %v4822_v4  ;;  %v3286_v42 = vsel %vm1645_vm7, %v1641_v30, 1326507024 }
 0x136   :  { %4823 = vst [vmem:[#allocation36_spill] sm:$0xff] %v3286_v42  ;;  %v4824_v10 = vand.u32 2147483647, %v2212_v28  ;;  %v1278_v29 = vand.u32 2147483647, %v1277_v18  ;;  %2065 = vcosq.f32 %v456_v14  ;;  %v461_v63 = vadd.s32 3, %v457_v0 }
 0x137   :  { %v557_v59 = vsel %vm474_vm11, %v556_v58, %v555_v53  ;;  %v1280_v41 = vcvt.s32.f32 %v1273_v37  ;;  %v3299_v15 = vsel %vm1948_vm13, 0, %v1947_v19  ;;  %v1068_v16 = vsub.s32 4294967266, %v3265_v51  ;;  %v4827_v58 = vld [vmem:[#allocation33_spill] sm:$0xff] }
 0x138   :  { %vm3292_vm1 = vcmp.le.f32.partialorder %v4824_v10, 0.7853982  ;;  %v1161_v30 = vsub.s32 0, %v3268_v57  ;;  %v271_v33 = vand.u32 8388607, %v4673_v55  ;;  %v3305_v9 = vshrl.u32 %v221_v56, 30 }
 0x139   :  { %v3307_v10 = vor.u32 %v282_v21, %v281_v49  ;;  %v3309_v18 = vor.u32 %v285_v7, %v284_v8  ;;  %v289_v0 = vor.u32 %v288_v60, %v287_v38  ;;  %2067 = vsinq.f32 %v456_v14  ;;  %v4834_v55 = vld [vmem:[#allocation40_spill] sm:$0xff] }
 0x13a   :  { %v1281_v53 = vmul.f32 %v1280_v41, %v1278_v29  ;;  %vm296_vm2 = vcmp.lt.s32.totalorder %v4827_v58, 1  ;;  %vm298_vm3 = vcmp.lt.s32.totalorder %v4827_v58, 3  ;;  %v3316_v19 = vsel %vm1748_vm4, %v3253_v54, 920167782 }
 0x13b   :  { %4828 = vst [vmem:[#allocation29_spill] sm:$0xff] %v3316_v19  ;;  %v3318_v37 = vand.u32 3, %v461_v63  ;;  %v558_v56 = vsub.s32 4, %v2877_v5  ;;  %v1377_v49 = vsub.s32 4294967266, %v3299_v15  ;;  %v560_v14 = vsel %vm3292_vm1, %v2212_v28, %v557_v59  ;;  %v4832_v59 = vld [vmem:[#allocation42_spill] sm:$0xff] }
 0x13c   :  { %v1069_v21 = vadd.s32 127, %v1068_v16  ;;  %v1938_v8 = vmin.u32 %v1161_v30, %v3268_v57  ;;  %v272_v7 = vor.u32 8388608, %v271_v33  ;;  %v4829_v38 = vand.u32 2147483647, %v2216_v31 }
 0x13d   :  { %v223_v29 = vshll.u32 %v3305_v9, 30  ;;  %vm297_vm12 = vcmp.lt.s32.totalorder %v4827_v58, 2  ;;  %v304_v63 = vsel %vm296_vm2, %v3307_v10, %v3309_v18  ;;  %v306_v41 = vsel %vm298_vm3, %v289_v0, %v4832_v59 }
 0x13e   :  { %vm3328_vm9 = vcmp.le.f32.partialorder %v4829_v38, 0.7853982  ;;  %v1282_v16 = vxor.u32 2147483648, %v1281_v53  ;;  %v1064_v30 = vsub.s32 32, %v3265_v51  ;;  %v308_v33 = vsel %vm296_vm2, %v3309_v18, %v289_v0  ;;  %v4833_v38 = vld [vmem:[#allocation43_spill] sm:$0xff] }
 0x13f   :  { %v310_v23 = vsel %vm298_vm3, %v4834_v55, %v4833_v38  ;;  %v559_v54 = vsel %vm474_vm11, %v558_v56, %v2877_v5  ;;  %vm1200_vm14 = vcmp.lt.s32.totalorder %v2216_v31, 0  ;;  %v1284_v59 = vsub.s32 4, %v2949_v1 }
 0x140   :  { %v1378_v19 = vadd.s32 127, %v1377_v49  ;;  %v1048_v35 = vadd.s32 %v2995_v61, %v2990_v50  ;;  %v1070_v39 = vshll.u32 %v1069_v21, 23  ;;  %v1163_v17 = vclz %v1938_v8  ;;  %v2066_v42 = vpop.eup %2065 }
 0x141   :  { %v307_v52 = vsel %vm297_vm12, %v304_v63, %v306_v41  ;;  %2069 = vcosq.f32 %v560_v14  ;;  %v3359_v55 = vsub.s32 %v3257_v22, %v223_v29  ;;  %v311_v5 = vsel %vm297_vm12, %v308_v33, %v310_v23 }
 0x142   :  { %v3363_v56 = vshll.u32 %v272_v7, 8  ;;  %vm464_vm5 = vcmp.eq.s32.totalorder %v3318_v37, 0  ;;  %v1283_v50 = vsel %vm1200_vm14, %v1282_v16, %v1281_v53  ;;  %v1357_v61 = vadd.s32 %v2936_v26, %v2933_v46 }
 0x143   :  { %v1373_v49 = vsub.s32 32, %v3299_v15  ;;  %v1066_v21 = vshrl.u32 %v1048_v35, %v1064_v30  ;;  %v1379_v8 = vshll.u32 %v1378_v19, 23  ;;  %v1065_v22 = vshll.u32 %v3122_v62, %v3265_v51  ;;  %v2068_v7 = vpop.eup %2067 }
 0x144   :  { %v3374_v29 = vmul.u32.u64.low %v3363_v56, %v307_v52  ;;  %v3375_v23 = vmul.u32.u64.high %v3363_v56, %v307_v52, %v3374_v29  ;;  %v1071_v63 = vor.u32 4788187, %v1070_v39  ;;  %v1939_v41 = vadd.s32 4294967294, %v1163_v17 }
 0x145   :  { %v3379_v53 = vmul.u32.u64.low %v3363_v56, %v311_v5  ;;  %v3380_v16 = vmul.u32.u64.high %v3363_v56, %v311_v5, %v3379_v53  ;;  %v561_v46 = vsel %vm3292_vm1, 0, %v559_v54  ;;  %2071 = vsinq.f32 %v560_v14 }
 0x146   :  { %v1285_v62 = vsel %vm1200_vm14, %v1284_v59, %v2949_v1  ;;  %v226_v26 = vsub.s32 0, %v3359_v55  ;;  %v1286_v35 = vsel %vm3328_vm9, %v2216_v31, %v1283_v50  ;;  %v1375_v39 = vshrl.u32 %v1357_v61, %v1373_v49 }
 0x147   :  { %v1067_v52 = vor.u32 %v1066_v21, %v1065_v22  ;;  %v280_v17 = vshrl.u32 %v4749_v43, %v4822_v4  ;;  %v465_v51 = vxor.u32 2147483648, %v2068_v7  ;;  %vm467_vm11 = vcmp.eq.s32.totalorder %v3318_v37, 2 }
 0x148   :  { %v468_v54 = vxor.u32 2147483648, %v2066_v42  ;;  %v301_v13 = vsel %vm299_vm0, %v289_v0, 2102212464  ;;  %v1374_v1 = vshll.u32 %v3150_v27, %v3299_v15  ;;  %v1380_v19 = vor.u32 4788187, %v1379_v8 }
 0x149   :  { %v1072_v14 = vand.u32 2147483647, %v1071_v63  ;;  %vm1940_vm6 = vcmp.lt.s32.totalorder %v1939_v41, 0  ;;  %v565_v30 = vadd.s32 3, %v561_v46  ;;  %v1287_v33 = vsel %vm3328_vm9, 0, %v1285_v62 }
 0x14a   :  { %2073 = vcosq.f32 %v1286_v35  ;;  %v1902_v4 = vmin.u32 %v226_v26, %v3359_v55  ;;  %vm460_vm13 = vweird.f32 %v4812_v48  ;;  %v1376_v38 = vor.u32 %v1375_v39, %v1374_v1  ;;  %v4841_v48 = vld [vmem:[#allocation12_spill] sm:$0xff] }
 0x14b   :  { %v1074_v59 = vcvt.s32.f32 %v1067_v52  ;;  %v300_v0 = vsel %vm296_vm2, %v280_v17, %v3307_v10  ;;  %v302_v27 = vsel %vm298_vm3, %v3309_v18, %v301_v13  ;;  %v2070_v15 = vpop.eup %2069  ;;  %v466_v60 = vsel %vm464_vm5, %v2066_v42, %v465_v51  ;;  %v4848_v52 = vld [vmem:[#allocation52_spill] sm:$0xff] }
 0x14c   :  { %v469_v5 = vsel %vm467_vm11, %v468_v54, %v2068_v7  ;;  %v3412_v50 = vsel %vm1940_vm6, 0, %v1939_v41  ;;  %v322_v61 = vadd.s32 1, %v3375_v23  ;;  %v1381_v49 = vand.u32 2147483647, %v1380_v19 }
 0x14d   :  { %v1387_v21 = vsub.s32 4, %v3093_v25  ;;  %v1075_v8 = vmul.f32 %v1074_v59, %v1072_v14  ;;  %vm321_vm0 = vc.u32 %v3380_v16, %v3374_v29  ;;  %v3418_v10 = vand.u32 3, %v565_v30  ;;  %v4842_v59 = vld [vmem:[#allocation45_spill] sm:$0xff] }
 0x14e   :  { %2075 = vsinq.f32 %v1286_v35  ;;  %v228_v18 = vclz %v1902_v4  ;;  %v303_v42 = vsel %vm297_vm12, %v300_v0, %v302_v27  ;;  %vm463_vm1 = vcmp.lt.s32.totalorder %v3318_v37, 2 }
 0x14f   :  { %v3423_v22 = vand.u32 3, %v1287_v33  ;;  %v1383_v7 = vcvt.s32.f32 %v1376_v38  ;;  %v1171_v63 = vsub.s32 4294967266, %v3412_v50  ;;  %v2072_v41 = vpop.eup %2071  ;;  %v470_v53 = vsel %vm463_vm1, %v466_v60, %v469_v5 }
 0x150   :  { %v572_v46 = vxor.u32 2147483648, %v2070_v15  ;;  %vm1303_vm2 = vcmp.lt.s32.totalorder %v2218_v32, 0  ;;  %v323_v62 = vsel %vm321_vm0, %v322_v61, %v3375_v23  ;;  %v1076_v35 = vxor.u32 2147483648, %v1075_v8  ;;  %v4843_v61 = vld [vmem:[#allocation25_spill] sm:$0xff] }
 0x151   :  { %v1384_v26 = vmul.f32 %v1383_v7, %v1381_v49  ;;  %v3431_v58 = vsel %vm1303_vm2, %v1387_v21, %v3093_v25  ;;  %v319_v37 = vmul.u32 %v3363_v56, %v303_v42  ;;  %vm568_vm3 = vcmp.eq.s32.totalorder %v3418_v10, 0  ;;  %v4844_v49 = vld [vmem:[#allocation28_spill] sm:$0xff] }
 0x152   :  { %vm571_vm9 = vcmp.eq.s32.totalorder %v3418_v10, 2  ;;  %v4835_v39 = vand.u32 2147483647, %v2218_v32  ;;  %v1903_v23 = vadd.s32 4294967294, %v228_v18  ;;  %v569_v17 = vxor.u32 2147483648, %v2072_v41 }
 0x153   :  { %vm1296_vm14 = vcmp.eq.s32.totalorder %v3423_v22, 2  ;;  %vm994_vm5 = vcmp.lt.s32.totalorder %v4780_v34, 0  ;;  %v1172_v25 = vadd.s32 127, %v1171_v63  ;;  %v3444_v51 = vadd.s32 %v323_v62, %v319_v37  ;;  %v4845_v63 = vld [vmem:[#allocation41_spill] sm:$0xff] }
 0x154   :  { %vm3438_vm12 = vcmp.le.f32.partialorder %v4835_v39, 0.7853982  ;;  %v2074_v56 = vpop.eup %2073  ;;  %v3448_v54 = vsel %vm460_vm13, nan, %v470_v53  ;;  %v573_v13 = vsel %vm571_vm9, %v572_v46, %v2072_v41  ;;  %v4838_v19 = vand.u32 2147483647, %v4780_v34 }
 0x155   :  { %v1390_v1 = vsel %vm3438_vm12, 0, %v3431_v58  ;;  %v1385_v30 = vxor.u32 2147483648, %v1384_v26  ;;  %v1077_v33 = vsel %vm994_vm5, %v1076_v35, %v1075_v8  ;;  %v1167_v4 = vsub.s32 32, %v3412_v50 }
 0x156   :  { %vm3455_vm11 = vcmp.le.f32.partialorder %v4838_v19, 0.7853982  ;;  %v4681_v38 = vand.u32 2147483647, %v4841_v48  ;;  %vm1904_vm6 = vcmp.lt.s32.totalorder %v1903_v23, 0  ;;  %v594_v0 = vshrl.u32 %v4745_v20, %v4842_v59 }
 0x157   :  { %v597_v27 = vshrl.u32 %v4746_v3, %v4842_v59  ;;  %v600_v60 = vshrl.u32 %v4718_v47, %v4842_v59  ;;  %v570_v5 = vsel %vm568_vm3, %v2070_v15, %v569_v17  ;;  %vm1293_vm13 = vcmp.eq.s32.totalorder %v3423_v22, 0 }
 0x158   :  { %v1151_v21 = vadd.s32 %v4844_v49, %v4843_v61  ;;  %v1173_v8 = vshll.u32 %v1172_v25, 23  ;;  %v325_v18 = vadd.s32 536870912, %v3444_v51  ;;  %v2076_v42 = vpop.eup %2075  ;;  %v1297_v7 = vxor.u32 2147483648, %v2074_v56  ;;  %v4846_v61 = vld [vmem:[#allocation20_spill] sm:$0xff] }
 0x159   :  { %v593_v41 = vshll.u32 %v4749_v43, %v4845_v63  ;;  %v596_v53 = vshll.u32 %v4745_v20, %v4845_v63  ;;  %v599_v46 = vshll.u32 %v4746_v3, %v4845_v63  ;;  %vm567_vm0 = vcmp.lt.s32.totalorder %v3418_v10, 2  ;;  %v4847_v49 = vld [vmem:[#allocation44_spill] sm:$0xff]  ;;  %v4850_v63 = vld [vmem:[#allocation49_spill] sm:$0xff] }
 0x15a   :  { %v1386_v15 = vsel %vm1303_vm2, %v1385_v30, %v1384_v26  ;;  %v1080_v62 = vsel %vm3455_vm11, %v4780_v34, %v1077_v33  ;;  %v1169_v58 = vshrl.u32 %v1151_v21, %v1167_v4  ;;  %v3488_v35 = vsel %vm1904_vm6, 0, %v1903_v23 }
 0x15b   :  { %vm1292_vm1 = vcmp.lt.s32.totalorder %v3423_v22, 2  ;;  %v583_v37 = vand.u32 8388607, %v4681_v38  ;;  %v3493_v39 = vor.u32 %v594_v0, %v593_v41  ;;  %v3495_v17 = vor.u32 %v597_v27, %v596_v53 }
 0x15c   :  { %v601_v25 = vor.u32 %v600_v60, %v599_v46  ;;  %v1294_v19 = vxor.u32 2147483648, %v2076_v42  ;;  %v1168_v26 = vshll.u32 %v3268_v57, %v3412_v50  ;;  %v1174_v30 = vor.u32 4788187, %v1173_v8 }
 0x15d   :  { %v3499_v33 = vshrl.u32 %v325_v18, 30  ;;  %v1298_v23 = vsel %vm1296_vm14, %v1297_v7, %v2076_v42  ;;  %v1389_v4 = vsel %vm3438_vm12, %v2218_v32, %v1386_v15  ;;  %v1078_v0 = vsub.s32 4, %v4846_v61  ;;  %v4849_v7 = vld [vmem:[#allocation53_spill] sm:$0xff]  ;;  %v4851_v15 = vld [vmem:[#allocation10_spill] sm:$0xff] }
 0x15e   :  { %v236_v27 = vsub.s32 4294967266, %v3488_v35  ;;  %2077 = vcosq.f32 %v1080_v62  ;;  %v1170_v60 = vor.u32 %v1169_v58, %v1168_v26  ;;  %vm608_vm2 = vcmp.lt.s32.totalorder %v4847_v49, 1 }
 0x15f   :  { %vm610_vm3 = vcmp.lt.s32.totalorder %v4847_v49, 3  ;;  %vm564_vm9 = vweird.f32 %v2212_v28  ;;  %2079 = vsinq.f32 %v1080_v62  ;;  %v584_v57 = vor.u32 8388608, %v583_v37 }
 0x160   :  { %v616_v50 = vsel %vm608_vm2, %v3493_v39, %v3495_v17  ;;  %v618_v21 = vsel %vm610_vm3, %v601_v25, %v4848_v52  ;;  %v1175_v8 = vand.u32 2147483647, %v1174_v30  ;;  %v327_v18 = vshll.u32 %v3499_v33, 30 }
 0x161   :  { %v620_v42 = vsel %vm608_vm2, %v3495_v17, %v601_v25  ;;  %v622_v41 = vsel %vm610_vm3, %v4850_v63, %v4849_v7  ;;  %v1295_v53 = vsel %vm1293_vm13, %v2074_v56, %v1294_v19  ;;  %2081 = vcosq.f32 %v1389_v4  ;;  %v4857_v63 = vld [vmem:[#allocation9_spill] sm:$0xff] }
 0x162   :  { %v237_v46 = vadd.s32 127, %v236_v27  ;;  %vm609_vm12 = vcmp.lt.s32.totalorder %v4847_v49, 2  ;;  %vm162_vm14 = vcmp.lt.s32.totalorder %v4851_v15, 0  ;;  %2083 = vsinq.f32 %v1389_v4  ;;  %v3541_v27 = vpop.permute.xlu1 %89 }
 0x163   :  { %v3530_v62 = vand.u32 3, %v1390_v1  ;;  %v1177_v58 = vcvt.s32.f32 %v1170_v60  ;;  %v619_v37 = vsel %vm609_vm12, %v616_v50, %v618_v21  ;;  %v574_v26 = vsel %vm567_vm0, %v570_v5, %v573_v13  ;;  %4852 = vst [vmem:[#allocation17_spill] sm:$0xff] %v3541_v27  ;;  %v3581_v21 = vpop.permute.xlu0 %105 }
 0x164   :  { %v232_v30 = vsub.s32 32, %v3488_v35  ;;  %v623_v56 = vsel %vm609_vm12, %v620_v42, %v622_v41  ;;  %v3539_v19 = vshll.u32 %v584_v57, 8  ;;  %v1299_v1 = vsel %vm1292_vm1, %v1295_v53, %v1298_v23  ;;  %4856 = vst [vmem:[#allocation39_spill] sm:$0xff] %v3581_v21 }
 0x165   :  { %v1079_v4 = vsel %vm994_vm5, %v1078_v0, %v4846_v61  ;;  %v1178_v60 = vmul.f32 %v1177_v58, %v1175_v8  ;;  %v3549_v10 = vsub.s32 %v3444_v51, %v327_v18  ;;  %v216_v13 = vadd.s32 %v3197_v24, %v3187_v36 }
 0x166   :  { %v238_v5 = vshll.u32 %v237_v46, 23  ;;  %v3554_v57 = vmul.u32.u64.low %v3539_v19, %v619_v37  ;;  %v3555_v50 = vmul.u32.u64.high %v3539_v19, %v619_v37, %v3554_v57  ;;  %v4853_v22 = vor.u32 %v3246_v44, %v3242_v2 }
 0x167   :  { %vm1290_vm5 = vweird.f32 %v2216_v31  ;;  %v3567_v51 = vmul.u32.u64.low %v3539_v19, %v623_v56  ;;  %v3568_v61 = vmul.u32.u64.high %v3539_v19, %v623_v56, %v3567_v51  ;;  %v3572_v36 = vmul.f32 %v3448_v54, %v3541_v27 }
 0x168   :  { %v3563_v23 = vsel %vm1748_vm4, %v4853_v22, 1326507024  ;;  %v1081_v24 = vsel %vm3455_vm11, 0, %v1079_v4  ;;  %v234_v0 = vshrl.u32 %v216_v13, %v232_v30  ;;  %v246_v2 = vsub.s32 4, %v3305_v9  ;;  %v2078_v44 = vpop.eup %2077 }
 0x169   :  { %4854 = vst [vmem:[#allocation22_spill] sm:$0xff] %v3563_v23  ;;  %v3579_v52 = vsel %vm564_vm9, nan, %v574_v26  ;;  %v1300_v31 = vsel %vm1290_vm5, nan, %v1299_v1  ;;  %v1179_v8 = vxor.u32 2147483648, %v1178_v60  ;;  %v330_v18 = vsub.s32 0, %v3549_v10  ;;  %v2080_v42 = vpop.eup %2079 }
 0x16a   :  { %4855 = vst [vmem:[#allocation24_spill] sm:$0xff] %v3579_v52  ;;  %vm1399_vm6 = vcmp.eq.s32.totalorder %v3530_v62, 2  ;;  %v233_v54 = vshll.u32 %v3359_v55, %v3488_v35  ;;  %v239_v14 = vor.u32 4788187, %v238_v5  ;;  %v613_v7 = vsel %vm611_vm8, %v601_v25, 2102212464 }
 0x16b   :  { %vm1396_vm11 = vcmp.eq.s32.totalorder %v3530_v62, 0  ;;  %v1085_v28 = vand.u32 3, %v1081_v24  ;;  %v4858_v41 = vand.u32 2147483647, %v4857_v63  ;;  %vm1097_vm0 = vcmp.lt.s32.totalorder %v4857_v63, 0  ;;  %v2082_v58 = vpop.eup %2081 }
 0x16c   :  { %v592_v46 = vshrl.u32 %v4749_v43, %v4842_v59  ;;  %v1826_v55 = vmul.f32 %v1300_v31, %v3581_v21  ;;  %v1181_v35 = vsub.s32 4, %v3217_v6  ;;  %v235_v25 = vor.u32 %v234_v0, %v233_v54  ;;  %v2084_v26 = vpop.eup %2083 }
 0x16d   :  { %vm3592_vm13 = vcmp.le.f32.partialorder %v4858_v41, 0.7853982  ;;  %v247_v37 = vsel %vm162_vm14, %v246_v2, %v3305_v9  ;;  %v1180_v30 = vsel %vm1097_vm0, %v1179_v8, %v1178_v60  ;;  %v1906_v56 = vmin.u32 %v330_v18, %v3549_v10 }
 0x16e   :  { %v612_v59 = vsel %vm608_vm2, %v592_v46, %v3493_v39  ;;  %v614_v1 = vsel %vm610_vm3, %v3495_v17, %v613_v7  ;;  %vm1395_vm8 = vcmp.lt.s32.totalorder %v3530_v62, 2  ;;  %v1088_v4 = vxor.u32 2147483648, %v2080_v42 }
 0x16f   :  { %v1091_v13 = vxor.u32 2147483648, %v2078_v44  ;;  %v240_v5 = vand.u32 2147483647, %v239_v14  ;;  %v634_v9 = vadd.s32 1, %v3555_v50  ;;  %v1400_v22 = vxor.u32 2147483648, %v2082_v58 }
 0x170   :  { %vm1087_vm1 = vcmp.eq.s32.totalorder %v1085_v28, 0  ;;  %v4861_v60 = vand.u32 2147483647, %v4851_v15  ;;  %vm633_vm2 = vc.u32 %v3568_v61, %v3554_v57  ;;  %v1397_v39 = vxor.u32 2147483648, %v2084_v26 }
 0x171   :  { %v1183_v17 = vsel %vm3592_vm13, %v4857_v63, %v1180_v30  ;;  %v242_v24 = vcvt.s32.f32 %v235_v25  ;;  %v615_v0 = vsel %vm609_vm12, %v612_v59, %v614_v1  ;;  %vm1090_vm3 = vcmp.eq.s32.totalorder %v1085_v28, 2 }
 0x172   :  { %vm3617_vm9 = vcmp.le.f32.partialorder %v4861_v60, 0.7853982  ;;  %v1182_v2 = vsel %vm1097_vm0, %v1181_v35, %v3217_v6  ;;  %v332_v8 = vclz %v1906_v56  ;;  %v1089_v18 = vsel %vm1087_vm1, %v2078_v44, %v1088_v4  ;;  %v4864_v35 = vld [vmem:[#allocation18_spill] sm:$0xff] }
 0x173   :  { %v249_v31 = vsel %vm3617_vm9, 0, %v247_v37  ;;  %v1092_v54 = vsel %vm1090_vm3, %v1091_v13, %v2080_v42  ;;  %v243_v14 = vmul.f32 %v242_v24, %v240_v5  ;;  %v635_v7 = vsel %vm633_vm2, %v634_v9, %v3555_v50  ;;  %v4867_v4 = vld [vmem:[#allocation46_spill] sm:$0xff] }
 0x174   :  { %v1401_v41 = vsel %vm1399_vm6, %v1400_v22, %v2084_v26  ;;  %vm1086_vm5 = vcmp.lt.s32.totalorder %v1085_v28, 2  ;;  %2085 = vcosq.f32 %v1183_v17  ;;  %v631_v49 = vmul.u32 %v3539_v19, %v615_v0  ;;  %v4865_v26 = vld [vmem:[#allocation48_spill] sm:$0xff]  ;;  %v4869_v0 = vld [vmem:[#allocation55_spill] sm:$0xff] }
 0x175   :  { %v1398_v46 = vsel %vm1396_vm11, %v2082_v58, %v1397_v39  ;;  %v1184_v6 = vsel %vm3592_vm13, 0, %v1182_v2  ;;  %2087 = vsinq.f32 %v1183_v17  ;;  %v4680_v44 = vand.u32 2147483647, %v4864_v35  ;;  %v4868_v17 = vld [vmem:[#allocation23_spill] sm:$0xff] }
 0x176   :  { %v1093_v42 = vsel %vm1086_vm5, %v1089_v18, %v1092_v54  ;;  %v253_v25 = vadd.s32 3, %v249_v31  ;;  %v1907_v37 = vadd.s32 4294967294, %v332_v8  ;;  %v3642_v50 = vadd.s32 %v635_v7, %v631_v49  ;;  %v4870_v7 = vld [vmem:[#allocation47_spill] sm:$0xff] }
 0x177   :  { %v244_v30 = vxor.u32 2147483648, %v243_v14  ;;  %v698_v28 = vshrl.u32 %v4745_v20, %v4865_v26  ;;  %v701_v19 = vshrl.u32 %v4746_v3, %v4865_v26  ;;  %v704_v58 = vshrl.u32 %v4718_v47, %v4865_v26 }
 0x178   :  { %v3652_v53 = vsel %vm1395_vm8, %v1398_v46, %v1401_v41  ;;  %v3655_v56 = vadd.f32 %v1826_v55, %v3572_v36  ;;  %vm1084_vm12 = vweird.f32 %v4780_v34  ;;  %v3658_v59 = vand.u32 3, %v1184_v6  ;;  %v3687_v41 = vpop.permute.xlu1 %101  ;;  %v4872_v46 = vld [vmem:[#allocation51_spill] sm:$0xff] }
 0x179   :  { %4866 = vst [vmem:[#allocation32_spill] sm:$0xff] %v3652_v53  ;;  %v687_v1 = vand.u32 8388607, %v4680_v44  ;;  %v697_v13 = vshll.u32 %v4749_v43, %v4867_v4  ;;  %v700_v5 = vshll.u32 %v4745_v20, %v4867_v4  ;;  %v703_v62 = vshll.u32 %v4746_v3, %v4867_v4  ;;  %4871 = vst [vmem:[#allocation37_spill] sm:$0xff] %v3687_v41  ;;  %v4875_v4 = vld [vmem:[#allocation54_spill] sm:$0xff] }
 0x17a   :  { %v1094_v9 = vsel %vm1084_vm12, nan, %v1093_v42  ;;  %v3668_v22 = vand.u32 3, %v253_v25  ;;  %vm1908_vm6 = vcmp.lt.s32.totalorder %v1907_v37, 0  ;;  %v637_v34 = vadd.s32 536870912, %v3642_v50 }
 0x17b   :  { %v245_v36 = vsel %vm162_vm14, %v244_v30, %v243_v14  ;;  %v699_v55 = vor.u32 %v698_v28, %v697_v13  ;;  %v3673_v60 = vor.u32 %v701_v19, %v700_v5  ;;  %v705_v39 = vor.u32 %v704_v58, %v703_v62  ;;  %v4873_v28 = vld [vmem:[#allocation57_spill] sm:$0xff] }
 0x17c   :  { %v4682_v24 = vand.u32 2147483647, %v4868_v17  ;;  %v1422_v2 = vshrl.u32 %v4745_v20, %v4869_v0  ;;  %v1425_v31 = vshrl.u32 %v4746_v3, %v4869_v0  ;;  %v1428_v8 = vshrl.u32 %v4718_v47, %v4869_v0 }
 0x17d   :  { %v3682_v18 = vsel %vm1908_vm6, 0, %v1907_v37  ;;  %v688_v54 = vor.u32 8388608, %v687_v1  ;;  %vm712_vm14 = vcmp.lt.s32.totalorder %v4870_v7, 1  ;;  %vm714_vm11 = vcmp.lt.s32.totalorder %v4870_v7, 3  ;;  %v4874_v1 = vld [vmem:[#allocation59_spill] sm:$0xff] }
 0x17e   :  { %v2086_v14 = vpop.eup %2085  ;;  %vm1193_vm13 = vcmp.eq.s32.totalorder %v3658_v59, 2  ;;  %v3689_v49 = vshrl.u32 %v637_v34, 30  ;;  %v1421_v6 = vshll.u32 %v4749_v43, %v4872_v46  ;;  %v1424_v42 = vshll.u32 %v4745_v20, %v4872_v46 }
 0x17f   :  { %v1427_v25 = vshll.u32 %v4746_v3, %v4872_v46  ;;  %v2088_v37 = vpop.eup %2087  ;;  %v720_v30 = vsel %vm712_vm14, %v699_v55, %v3673_v60  ;;  %v722_v19 = vsel %vm714_vm11, %v705_v39, %v4873_v28  ;;  %v724_v58 = vsel %vm712_vm14, %v3673_v60, %v705_v39 }
 0x180   :  { %v726_v13 = vsel %vm714_vm11, %v4875_v4, %v4874_v1  ;;  %vm1190_vm0 = vcmp.eq.s32.totalorder %v3658_v59, 0  ;;  %v1411_v5 = vand.u32 8388607, %v4682_v24  ;;  %v3713_v62 = vor.u32 %v1422_v2, %v1421_v6  ;;  %v4876_v6 = vld [vmem:[#allocation50_spill] sm:$0xff] }
 0x181   :  { %v3715_v34 = vor.u32 %v1425_v31, %v1424_v42  ;;  %v1429_v46 = vor.u32 %v1428_v8, %v1427_v25  ;;  %v1194_v28 = vxor.u32 2147483648, %v2086_v14  ;;  %v3718_v44 = vmul.f32 %v1094_v9, %v3687_v41  ;;  %v4879_v24 = vld [vmem:[#allocation62_spill] sm:$0xff] }
 0x182   :  { %v320_v38 = vadd.s32 %v3374_v29, %v3380_v16  ;;  %vm713_vm8 = vcmp.lt.s32.totalorder %v4870_v7, 2  ;;  %v1191_v1 = vxor.u32 2147483648, %v2088_v37  ;;  %v248_v4 = vsel %vm3617_vm9, %v4851_v15, %v245_v36  ;;  %v4877_v36 = vld [vmem:[#allocation64_spill] sm:$0xff] }
 0x183   :  { %v723_v2 = vsel %vm713_vm8, %v720_v30, %v722_v19  ;;  %v727_v31 = vsel %vm713_vm8, %v724_v58, %v726_v13  ;;  %v340_v8 = vsub.s32 4294967266, %v3682_v18  ;;  %v3731_v9 = vshll.u32 %v688_v54, 8 }
 0x184   :  { %vm1436_vm1 = vcmp.lt.s32.totalorder %v4876_v6, 1  ;;  %vm1438_vm2 = vcmp.lt.s32.totalorder %v4876_v6, 3  ;;  %v639_v29 = vshll.u32 %v3689_v49, 30  ;;  %v1412_v16 = vor.u32 8388608, %v1411_v5  ;;  %v4878_v5 = vld [vmem:[#allocation68_spill] sm:$0xff] }
 0x185   :  { %v1444_v51 = vsel %vm1436_vm1, %v3713_v62, %v3715_v34  ;;  %v1446_v42 = vsel %vm1438_vm2, %v1429_v46, %v4877_v36  ;;  %v3744_v25 = vmul.u32.u64.low %v3731_v9, %v727_v31  ;;  %v3745_v54 = vmul.u32.u64.high %v3731_v9, %v727_v31, %v3744_v25 }
 0x186   :  { %v3748_v30 = vmul.u32.u64.low %v3731_v9, %v723_v2  ;;  %v3749_v19 = vmul.u32.u64.high %v3731_v9, %v723_v2, %v3748_v30  ;;  %v336_v58 = vsub.s32 32, %v3682_v18  ;;  %vm1437_vm9 = vcmp.lt.s32.totalorder %v4876_v6, 2 }
 0x187   :  { %v1448_v13 = vsel %vm1436_vm1, %v3715_v34, %v1429_v46  ;;  %v1450_v36 = vsel %vm1438_vm2, %v4879_v24, %v4878_v5  ;;  %vm266_vm3 = vcmp.lt.s32.totalorder %v4820_v12, 0  ;;  %v3764_v2 = vsel %vm1193_vm13, %v1194_v28, %v2088_v37 }
 0x188   :  { %v696_v31 = vshrl.u32 %v4749_v43, %v4865_v26  ;;  %v717_v25 = vsel %vm715_vm15, %v705_v39, 2102212464  ;;  %v1447_v21 = vsel %vm1437_vm9, %v1444_v51, %v1446_v42  ;;  %v341_v52 = vadd.s32 127, %v340_v8 }
 0x189   :  { %v350_v27 = vsub.s32 4, %v3499_v33  ;;  %v3774_v24 = vsub.s32 %v3642_v50, %v639_v29  ;;  %v3776_v5 = vshll.u32 %v1412_v16, 8  ;;  %v1192_v37 = vsel %vm1190_vm0, %v2086_v14, %v1191_v1  ;;  %v4880_v16 = vld [vmem:[#allocation27_spill] sm:$0xff]  ;;  %v4881_v14 = vld [vmem:[#allocation60_spill] sm:$0xff] }
 0x18a   :  { %2089 = vcosq.f32 %v248_v4  ;;  %v716_v26 = vsel %vm712_vm14, %v696_v31, %v699_v55  ;;  %v1451_v39 = vsel %vm1437_vm9, %v1448_v13, %v1450_v36  ;;  %v338_v28 = vshrl.u32 %v320_v38, %v336_v58 }
 0x18b   :  { %v718_v8 = vsel %vm714_vm11, %v3673_v60, %v717_v25  ;;  %v3788_v50 = vmul.u32.u64.low %v3776_v5, %v1447_v21  ;;  %v3789_v29 = vmul.u32.u64.high %v3776_v5, %v1447_v21, %v3788_v50  ;;  %v1525_v1 = vshrl.u32 %v4745_v20, %v4881_v14  ;;  %v4885_v25 = vld [vmem:[#allocation56_spill] sm:$0xff] }
 0x18c   :  { %v1528_v55 = vshrl.u32 %v4746_v3, %v4881_v14  ;;  %v1531_v38 = vshrl.u32 %v4718_v47, %v4881_v14  ;;  %v4882_v42 = vand.u32 2147483647, %v4820_v12  ;;  %v342_v21 = vshll.u32 %v341_v52, 23 }
 0x18d   :  { %v642_v58 = vsub.s32 0, %v3774_v24  ;;  %v3807_v13 = vmul.u32.u64.low %v3776_v5, %v1451_v39  ;;  %v3808_v36 = vmul.u32.u64.high %v3776_v5, %v1451_v39, %v3807_v13  ;;  %vm1189_vm5 = vcmp.lt.s32.totalorder %v3658_v59, 2 }
 0x18e   :  { %vm3801_vm15 = vcmp.le.f32.partialorder %v4882_v42, 0.7853982  ;;  %v738_v31 = vadd.s32 1, %v3749_v19  ;;  %v1524_v51 = vshll.u32 %v4749_v43, %v4885_v25  ;;  %v1527_v42 = vshll.u32 %v4745_v20, %v4885_v25 }
 0x18f   :  { %v1530_v41 = vshll.u32 %v4746_v3, %v4885_v25  ;;  %v337_v52 = vshll.u32 %v3549_v10, %v3682_v18  ;;  %v719_v39 = vsel %vm713_vm8, %v716_v26, %v718_v8  ;;  %vm737_vm12 = vc.u32 %v3745_v54, %v3748_v30 }
 0x190   :  { %vm4886_vm6 = vcmp.lt.s32.totalorder %v4876_v6, 4  ;;  %v4887_v53 = vand.u32 2147483647, %v4880_v16  ;;  %v3828_v23 = vor.u32 %v1525_v1, %v1524_v51  ;;  %v3830_v17 = vor.u32 %v1528_v55, %v1527_v42  ;;  %v4890_v1 = vld [vmem:[#allocation71_spill] sm:$0xff]  ;;  %v4891_v55 = vld [vmem:[#allocation66_spill] sm:$0xff] }
 0x191   :  { %v1441_v13 = vsel %vm4886_vm6, %v1429_v46, 2102212464  ;;  %v1532_v25 = vor.u32 %v1531_v38, %v1530_v41  ;;  %2091 = vsinq.f32 %v248_v4  ;;  %v351_v10 = vsel %vm266_vm3, %v350_v27, %v3499_v33  ;;  %v4888_v33 = vld [vmem:[#allocation58_spill] sm:$0xff] }
 0x192   :  { %v1514_v32 = vand.u32 8388607, %v4887_v53  ;;  %v1918_v18 = vmin.u32 %v642_v58, %v3774_v24  ;;  %v1420_v7 = vshrl.u32 %v4749_v43, %v4869_v0  ;;  %v339_v26 = vor.u32 %v338_v28, %v337_v52 }
 0x193   :  { %v343_v46 = vor.u32 4788187, %v342_v21  ;;  %v735_v8 = vmul.u32 %v3731_v9, %v719_v39  ;;  %v739_v53 = vsel %vm737_vm12, %v738_v31, %v3749_v19  ;;  %v1442_v4 = vsel %vm1438_vm2, %v3715_v34, %v1441_v13  ;;  %v4889_v19 = vld [vmem:[#allocation69_spill] sm:$0xff] }
 0x194   :  { %v1440_v41 = vsel %vm1436_vm1, %v1420_v7, %v3713_v62  ;;  %vm1539_vm14 = vcmp.lt.s32.totalorder %v4888_v33, 1  ;;  %vm1541_vm11 = vcmp.lt.s32.totalorder %v4888_v33, 3  ;;  %v3848_v27 = vpop.eup %2089  ;;  %v1462_v0 = vadd.s32 1, %v3789_v29 }
 0x195   :  { %v1515_v28 = vor.u32 8388608, %v1514_v32  ;;  %v1547_v9 = vsel %vm1539_vm14, %v3828_v23, %v3830_v17  ;;  %v1549_v62 = vsel %vm1541_vm11, %v1532_v25, %v4889_v19  ;;  %v644_v51 = vclz %v1918_v18  ;;  %v4892_v18 = vld [vmem:[#allocation34_spill] sm:$0xff] }
 0x196   :  { %vm1461_vm13 = vc.u32 %v3808_v36, %v3788_v50  ;;  %v1551_v34 = vsel %vm1539_vm14, %v3830_v17, %v1532_v25  ;;  %v1553_v32 = vsel %vm1541_vm11, %v4891_v55, %v4890_v1  ;;  %v344_v38 = vand.u32 2147483647, %v343_v46 }
 0x197   :  { %v353_v21 = vsel %vm3801_vm15, 0, %v351_v10  ;;  %v1443_v58 = vsel %vm1437_vm9, %v1440_v41, %v1442_v4  ;;  %vm1540_vm0 = vcmp.lt.s32.totalorder %v4888_v33, 2  ;;  %v3875_v31 = vsel %vm1189_vm5, %v1192_v37, %v3764_v2 }
 0x198   :  { %v346_v42 = vcvt.s32.f32 %v339_v26  ;;  %v3877_v52 = vadd.s32 %v739_v53, %v735_v8  ;;  %v1550_v39 = vsel %vm1540_vm0, %v1547_v9, %v1549_v62  ;;  %v1463_v13 = vsel %vm1461_vm13, %v1462_v0, %v3789_v29  ;;  %v4893_v29 = vld [vmem:[#allocation63_spill] sm:$0xff]  ;;  %v4894_v62 = vld [vmem:[#allocation61_spill] sm:$0xff] }
 0x199   :  { %v1554_v10 = vsel %vm1540_vm0, %v1551_v34, %v1553_v32  ;;  %v3884_v6 = vshll.u32 %v1515_v28, 8  ;;  %v4689_v7 = vand.u32 2147483647, %v4892_v18  ;;  %v3887_v46 = vadd.s32 3, %v353_v21  ;;  %v4896_v18 = vld [vmem:[#allocation65_spill] sm:$0xff] }
 0x19a   :  { %v1919_v59 = vadd.s32 4294967294, %v644_v51  ;;  %v1459_v37 = vmul.u32 %v3776_v5, %v1443_v58  ;;  %v347_v26 = vmul.f32 %v346_v42, %v344_v38  ;;  %v802_v41 = vshrl.u32 %v4745_v20, %v4893_v29 }
 0x19b   :  { %v3892_v8 = vmul.u32.u64.low %v3884_v6, %v1550_v39  ;;  %v3893_v53 = vmul.u32.u64.high %v3884_v6, %v1550_v39, %v3892_v8  ;;  %v3898_v4 = vpop.eup %2091  ;;  %v741_v0 = vadd.s32 536870912, %v3877_v52  ;;  %v791_v5 = vand.u32 8388607, %v4689_v7 }
 0x19c   :  { %v3901_v28 = vadd.s32 %v1463_v13, %v1459_v37  ;;  %v3904_v9 = vmul.u32.u64.low %v3884_v6, %v1554_v10  ;;  %v3905_v19 = vmul.u32.u64.high %v3884_v6, %v1554_v10, %v3904_v9  ;;  %v801_v51 = vshll.u32 %v4749_v43, %v4894_v62 }
 0x19d   :  { %v804_v34 = vshll.u32 %v4745_v20, %v4894_v62  ;;  %v805_v1 = vshrl.u32 %v4746_v3, %v4893_v29  ;;  %v260_v55 = vxor.u32 2147483648, %v3848_v27  ;;  %vm1920_vm8 = vcmp.lt.s32.totalorder %v1919_v59, 0 }
 0x19e   :  { %v807_v32 = vshll.u32 %v4746_v3, %v4894_v62  ;;  %v808_v38 = vshrl.u32 %v4718_v47, %v4893_v29  ;;  %v257_v21 = vxor.u32 2147483648, %v3898_v4  ;;  %vm4895_vm1 = vcmp.lt.s32.totalorder %v4888_v33, 4 }
 0x19f   :  { %v1544_v58 = vsel %vm4895_vm1, %v1532_v25, 2102212464  ;;  %v803_v42 = vor.u32 %v802_v41, %v801_v51  ;;  %v806_v39 = vor.u32 %v805_v1, %v804_v34  ;;  %v348_v13 = vxor.u32 2147483648, %v347_v26  ;;  %v4897_v41 = vld [vmem:[#allocation77_spill] sm:$0xff]  ;;  %v4899_v34 = vld [vmem:[#allocation76_spill] sm:$0xff] }
 0x1a0   :  { %v1465_v10 = vadd.s32 536870912, %v3901_v28  ;;  %v1523_v37 = vshrl.u32 %v4749_v43, %v4881_v14  ;;  %v809_v9 = vor.u32 %v808_v38, %v807_v32  ;;  %vm256_vm2 = vcmp.eq.s32.totalorder %v3668_v22, 0 }
 0x1a1   :  { %vm259_vm9 = vcmp.eq.s32.totalorder %v3668_v22, 2  ;;  %v3928_v62 = vsel %vm1920_vm8, 0, %v1919_v59  ;;  %v3930_v7 = vshrl.u32 %v741_v0, 30  ;;  %v792_v2 = vor.u32 8388608, %v791_v5  ;;  %v4898_v59 = vld [vmem:[#allocation72_spill] sm:$0xff] }
 0x1a2   :  { %vm818_vm5 = vcmp.lt.s32.totalorder %v4896_v18, 3  ;;  %vm1187_vm12 = vweird.f32 %v4857_v63  ;;  %v1543_v25 = vsel %vm1539_vm14, %v1523_v37, %v3828_v23  ;;  %v1545_v14 = vsel %vm1541_vm11, %v3830_v17, %v1544_v58 }
 0x1a3   :  { %vm816_vm6 = vcmp.lt.s32.totalorder %v4896_v18, 1  ;;  %v830_v0 = vsel %vm818_vm5, %v4898_v59, %v4897_v41  ;;  %vm578_vm13 = vcmp.lt.s32.totalorder %v4841_v48, 0  ;;  %v1565_v5 = vadd.s32 1, %v3893_v53 }
 0x1a4   :  { %v824_v51 = vsel %vm816_vm6, %v803_v42, %v806_v39  ;;  %v826_v23 = vsel %vm818_vm5, %v809_v9, %v4899_v34  ;;  %v828_v17 = vsel %vm816_vm6, %v806_v39, %v809_v9  ;;  %vm255_vm14 = vcmp.lt.s32.totalorder %v3668_v22, 2 }
 0x1a5   :  { %v652_v1 = vsub.s32 4294967266, %v3928_v62  ;;  %v3956_v32 = vshrl.u32 %v1465_v10, 30  ;;  %vm1564_vm11 = vc.u32 %v3905_v19, %v3892_v8  ;;  %vm817_vm8 = vcmp.lt.s32.totalorder %v4896_v18, 2 }
 0x1a6   :  { %v1546_v38 = vsel %vm1540_vm0, %v1543_v25, %v1545_v14  ;;  %vm4900_vm1 = vcmp.lt.s32.totalorder %v4896_v18, 4  ;;  %v831_v37 = vsel %vm817_vm8, %v828_v17, %v830_v0  ;;  %v832_v41 = vshll.u32 %v792_v2, 8 }
 0x1a7   :  { %v821_v58 = vsel %vm4900_vm1, %v809_v9, 2102212464  ;;  %v349_v59 = vsel %vm266_vm3, %v348_v13, %v347_v26  ;;  %v648_v10 = vsub.s32 32, %v3928_v62  ;;  %v800_v34 = vshrl.u32 %v4749_v43, %v4893_v29 }
 0x1a8   :  { %v827_v16 = vsel %vm817_vm8, %v824_v51, %v826_v23  ;;  %v743_v33 = vshll.u32 %v3930_v7, 30  ;;  %v1566_v25 = vsel %vm1564_vm11, %v1565_v5, %v3893_v53  ;;  %v1467_v2 = vshll.u32 %v3956_v32, 30 }
 0x1a9   :  { %v3976_v9 = vmul.u32.u64.low %v832_v41, %v831_v37  ;;  %v3977_v14 = vmul.u32.u64.high %v832_v41, %v831_v37, %v3976_v9  ;;  %v1562_v0 = vmul.u32 %v3884_v6, %v1546_v38  ;;  %v820_v26 = vsel %vm816_vm6, %v800_v34, %v803_v42 }
 0x1aa   :  { %v822_v29 = vsel %vm818_vm5, %v806_v39, %v821_v58  ;;  %v4901_v13 = vand.u32 2147483647, %v4841_v48  ;;  %v632_v53 = vadd.s32 %v3554_v57, %v3568_v61  ;;  %v653_v5 = vadd.s32 127, %v652_v1  ;;  %v4906_v58 = vld [vmem:[#allocation38_spill] sm:$0xff] }
 0x1ab   :  { %v3993_v23 = vmul.u32.u64.low %v832_v41, %v827_v16  ;;  %v3994_v17 = vmul.u32.u64.high %v832_v41, %v827_v16, %v3993_v23  ;;  %v258_v6 = vsel %vm256_vm2, %v3848_v27, %v257_v21  ;;  %v261_v42 = vsel %vm259_vm9, %v260_v55, %v3898_v4 }
 0x1ac   :  { %vm3987_vm3 = vcmp.le.f32.partialorder %v4901_v13, 0.7853982  ;;  %v352_v39 = vsel %vm3801_vm15, %v4820_v12, %v349_v59  ;;  %v4006_v38 = vadd.s32 %v1566_v25, %v1562_v0  ;;  %v4011_v57 = vsel %vm1187_vm12, nan, %v3875_v31  ;;  %v4907_v59 = vld [vmem:[#allocation75_spill] sm:$0xff] }
 0x1ad   :  { %4904 = vst [vmem:[#allocation6_spill] sm:$0xff] %v4011_v57  ;;  %vm252_vm0 = vweird.f32 %v4851_v15  ;;  %v4015_v61 = vand.u32 3, %v3887_v46  ;;  %v4018_v16 = vsub.s32 %v3877_v52, %v743_v33  ;;  %v823_v27 = vsel %vm817_vm8, %v820_v26, %v822_v29 }
 0x1ae   :  { %v650_v60 = vshrl.u32 %v632_v53, %v648_v10  ;;  %v4905_v4 = vsub.s32 4, %v3689_v49  ;;  %v4028_v31 = vsub.s32 %v3901_v28, %v1467_v2  ;;  %vm841_vm15 = vc.u32 %v3977_v14, %v3993_v23 }
 0x1af   :  { %v262_v52 = vsel %vm255_vm14, %v258_v6, %v261_v42  ;;  %2093 = vcosq.f32 %v352_v39  ;;  %v654_v46 = vshll.u32 %v653_v5, 23  ;;  %v842_v18 = vadd.s32 1, %v3994_v17 }
 0x1b0   :  { %v663_v63 = vsel %vm578_vm13, %v4905_v4, %v3689_v49  ;;  %2095 = vsinq.f32 %v352_v39  ;;  %v649_v55 = vshll.u32 %v3774_v24, %v3928_v62  ;;  %v1568_v21 = vadd.s32 536870912, %v4006_v38 }
 0x1b1   :  { %v839_v49 = vmul.u32 %v832_v41, %v823_v27  ;;  %v746_v28 = vsub.s32 0, %v4018_v16  ;;  %v843_v1 = vsel %vm841_vm15, %v842_v18, %v3994_v17  ;;  %v4693_v37 = vand.u32 2147483647, %v4906_v58  ;;  %v4908_v41 = vld [vmem:[#allocation74_spill] sm:$0xff] }
 0x1b2   :  { %v909_v22 = vshrl.u32 %v4746_v3, %v4907_v59  ;;  %vm682_vm2 = vcmp.lt.s32.totalorder %v4864_v35, 0  ;;  %v651_v10 = vor.u32 %v650_v60, %v649_v55  ;;  %v1470_v34 = vsub.s32 0, %v4028_v31 }
 0x1b3   :  { %v844_v33 = vadd.s32 %v843_v1, %v839_v49  ;;  %v906_v24 = vshrl.u32 %v4745_v20, %v4907_v59  ;;  %v655_v62 = vor.u32 4788187, %v654_v46  ;;  %v908_v25 = vshll.u32 %v4745_v20, %v4908_v41  ;;  %v4074_v49 = vpop.permute.xlu0 %85 }
 0x1b4   :  { %v911_v9 = vshll.u32 %v4746_v3, %v4908_v41  ;;  %v912_v2 = vshrl.u32 %v4718_v47, %v4907_v59  ;;  %v665_v0 = vsel %vm3987_vm3, 0, %v663_v63  ;;  %v4055_v26 = vshrl.u32 %v1568_v21, 30  ;;  %4912 = vst [vmem:[#allocation11_spill] sm:$0xff] %v4074_v49 }
 0x1b5   :  { %v845_v29 = vadd.s32 536870912, %v844_v33  ;;  %v905_v13 = vshll.u32 %v4749_v43, %v4908_v41  ;;  %v4909_v53 = vand.u32 2147483647, %v4864_v35  ;;  %v1922_v17 = vmin.u32 %v746_v28, %v4018_v16 }
 0x1b6   :  { %v895_v6 = vand.u32 8388607, %v4693_v37  ;;  %v910_v42 = vor.u32 %v909_v22, %v908_v25  ;;  %v913_v39 = vor.u32 %v912_v2, %v911_v9  ;;  %v263_v27 = vsel %vm252_vm0, nan, %v262_v52  ;;  %v4913_v22 = vld [vmem:[#allocation73_spill] sm:$0xff] }
 0x1b7   :  { %vm4061_vm9 = vcmp.le.f32.partialorder %v4909_v53, 0.7853982  ;;  %v1950_v60 = vmin.u32 %v1470_v34, %v4028_v31  ;;  %v4071_v4 = vshrl.u32 %v845_v29, 30  ;;  %v907_v63 = vor.u32 %v906_v24, %v905_v13  ;;  %v4916_v29 = vld [vmem:[#allocation8_spill] sm:$0xff] }
 0x1b8   :  { %v656_v46 = vand.u32 2147483647, %v655_v62  ;;  %v658_v18 = vcvt.s32.f32 %v651_v10  ;;  %v669_v55 = vadd.s32 3, %v665_v0  ;;  %v766_v21 = vsub.s32 4, %v3930_v7  ;;  %v4914_v10 = vld [vmem:[#allocation13_spill] sm:$0xff]  ;;  %v4915_v62 = vld [vmem:[#allocation14_spill] sm:$0xff] }
 0x1b9   :  { %v1570_v28 = vshll.u32 %v4055_v26, 30  ;;  %v847_v1 = vshll.u32 %v4071_v4, 30  ;;  %vm920_vm5 = vcmp.lt.s32.totalorder %v4913_v22, 1  ;;  %vm922_vm12 = vcmp.lt.s32.totalorder %v4913_v22, 3  ;;  %v2094_v15 = vpop.eup %2093 }
 0x1ba   :  { %v748_v52 = vclz %v1922_v17  ;;  %v896_v34 = vor.u32 8388608, %v895_v6  ;;  %v932_v24 = vsel %vm920_vm5, %v910_v42, %v913_v39  ;;  %v934_v41 = vsel %vm922_vm12, %v4915_v62, %v4914_v10  ;;  %v2096_v25 = vpop.eup %2095 }
 0x1bb   :  { %v1472_v9 = vclz %v1950_v60  ;;  %v4086_v2 = vsub.s32 %v844_v33, %v847_v1  ;;  %v928_v0 = vsel %vm920_vm5, %v907_v63, %v910_v42  ;;  %v930_v13 = vsel %vm922_vm12, %v913_v39, %v4916_v29 }
 0x1bc   :  { %v1816_v53 = vmul.f32 %v263_v27, %v4074_v49  ;;  %v659_v17 = vmul.f32 %v658_v18, %v656_v46  ;;  %v767_v6 = vsel %vm682_vm2, %v766_v21, %v3930_v7  ;;  %vm921_vm6 = vcmp.lt.s32.totalorder %v4913_v22, 2 }
 0x1bd   :  { %v4099_v60 = vsub.s32 %v4006_v38, %v1570_v28  ;;  %v850_v33 = vsub.s32 0, %v4086_v2  ;;  %v925_v1 = vsel %vm923_vm10, %v913_v39, 2102212464  ;;  %v935_v10 = vsel %vm921_vm6, %v932_v24, %v934_v41 }
 0x1be   :  { %v1923_v62 = vadd.s32 4294967294, %v748_v52  ;;  %v904_v27 = vshrl.u32 %v4749_v43, %v4907_v59  ;;  %v931_v7 = vsel %vm921_vm6, %v928_v0, %v930_v13  ;;  %v936_v46 = vshll.u32 %v896_v34, 8 }
 0x1bf   :  { %vm359_vm14 = vcmp.lt.s32.totalorder %v4015_v61, 2  ;;  %v361_v38 = vxor.u32 2147483648, %v2096_v25  ;;  %v364_v18 = vxor.u32 2147483648, %v2094_v15  ;;  %v769_v21 = vsel %vm4061_vm9, 0, %v767_v6 }
 0x1c0   :  { %v1951_v28 = vadd.s32 4294967294, %v1472_v9  ;;  %v924_v39 = vsel %vm920_vm5, %v904_v27, %v907_v63  ;;  %v926_v52 = vsel %vm922_vm12, %v910_v42, %v925_v1  ;;  %v1573_v41 = vsub.s32 0, %v4099_v60 }
 0x1c1   :  { %v4117_v24 = vmul.u32.u64.low %v936_v46, %v935_v10  ;;  %v4118_v59 = vmul.u32.u64.high %v936_v46, %v935_v10, %v4117_v24  ;;  %v1926_v34 = vmin.u32 %v850_v33, %v4086_v2  ;;  %vm360_vm10 = vcmp.eq.s32.totalorder %v4015_v61, 0 }
 0x1c2   :  { %v4122_v0 = vmul.u32.u64.low %v936_v46, %v931_v7  ;;  %v4123_v29 = vmul.u32.u64.high %v936_v46, %v931_v7, %v4122_v0  ;;  %v1832_v9 = vadd.f32 %v3718_v44, %v1816_v53  ;;  %v660_v13 = vxor.u32 2147483648, %v659_v17 }
 0x1c3   :  { %vm1924_vm11 = vcmp.lt.s32.totalorder %v1923_v62, 0  ;;  %vm363_vm8 = vcmp.eq.s32.totalorder %v4015_v61, 2  ;;  %v4129_v42 = vand.u32 3, %v669_v55  ;;  %v773_v63 = vadd.s32 3, %v769_v21 }
 0x1c4   :  { %v927_v6 = vsel %vm921_vm6, %v924_v39, %v926_v52  ;;  %v362_v1 = vsel %vm360_vm10, %v2094_v15, %v361_v38  ;;  %v365_v33 = vsel %vm363_vm8, %v364_v18, %v2096_v25  ;;  %vm1952_vm1 = vcmp.lt.s32.totalorder %v1951_v28, 0  ;;  %v4917_v18 = vld [vmem:[#allocation67_spill] sm:$0xff] }
 0x1c5   :  { %vm945_vm0 = vc.u32 %v4118_v59, %v4122_v0  ;;  %v751_v10 = vsel %vm1924_vm11, 0, %v1923_v62  ;;  %v1954_v27 = vmin.u32 %v1573_v41, %v4099_v60  ;;  %v852_v44 = vclz %v1926_v34  ;;  %v4918_v34 = vld [vmem:[#allocation16_spill] sm:$0xff] }
 0x1c6   :  { %v946_v53 = vadd.s32 1, %v4123_v29  ;;  %v4138_v7 = vadd.f32 %v3655_v56, %v1832_v9  ;;  %v661_v55 = vsel %vm578_vm13, %v660_v13, %v659_v17  ;;  %v736_v22 = vadd.s32 %v3748_v30, %v3745_v54 }
 0x1c7   :  { %v943_v15 = vmul.u32 %v936_v46, %v927_v6  ;;  %v4144_v25 = vand.u32 3, %v773_v63  ;;  %v1475_v38 = vsel %vm1952_vm1, 0, %v1951_v28  ;;  %v4692_v21 = vand.u32 2147483647, %v4917_v18 }
 0x1c8   :  { %v947_v62 = vsel %vm945_vm0, %v946_v53, %v4123_v29  ;;  %v4150_v39 = vsel %vm359_vm14, %v362_v1, %v365_v33  ;;  %v752_v56 = vsub.s32 32, %v751_v10  ;;  %v756_v52 = vsub.s32 4294967266, %v751_v10 }
 0x1c9   :  { %v948_v24 = vadd.s32 %v947_v62, %v943_v15  ;;  %v1575_v41 = vclz %v1954_v27  ;;  %v1927_v17 = vadd.s32 4294967294, %v852_v44  ;;  %v1630_v54 = vshll.u32 %v4745_v20, %v4918_v34 }
 0x1ca   :  { %v1631_v30 = vshrl.u32 %v4746_v3, %v3082_v40  ;;  %v1480_v46 = vsub.s32 4294967266, %v1475_v38  ;;  %v1633_v29 = vshll.u32 %v4746_v3, %v4918_v34  ;;  %v1634_v61 = vshrl.u32 %v4718_v47, %v3082_v40 }
 0x1cb   :  { %v949_v28 = vadd.s32 536870912, %v948_v24  ;;  %v664_v9 = vsel %vm3987_vm3, %v4841_v48, %v661_v55  ;;  %v1617_v13 = vand.u32 8388607, %v4692_v21  ;;  %v1628_v63 = vshrl.u32 %v4745_v20, %v3082_v40 }
 0x1cc   :  { %v1632_v6 = vor.u32 %v1631_v30, %v1630_v54  ;;  %v753_v1 = vshll.u32 %v4018_v16, %v751_v10  ;;  %v754_v33 = vshrl.u32 %v736_v22, %v752_v56  ;;  %v1635_v44 = vor.u32 %v1634_v61, %v1633_v29  ;;  %v4919_v30 = vld [vmem:[#allocation36_spill] sm:$0xff]  ;;  %v4921_v61 = vld [vmem:[#allocation21_spill] sm:$0xff] }
 0x1cd   :  { %v4168_v27 = vshrl.u32 %v949_v28, 30  ;;  %v757_v53 = vadd.s32 127, %v756_v52  ;;  %v1955_v15 = vadd.s32 4294967294, %v1575_v41  ;;  %vm1928_vm13 = vcmp.lt.s32.totalorder %v1927_v17, 0 }
 0x1ce   :  { %v1627_v51 = vshll.u32 %v4749_v43, %v4918_v34  ;;  %v1476_v55 = vsub.s32 32, %v1475_v38  ;;  %v1481_v62 = vadd.s32 127, %v1480_v46  ;;  %vm1642_vm3 = vcmp.lt.s32.totalorder %v3062_v11, 1  ;;  %v4920_v46 = vld [vmem:[#allocation15_spill] sm:$0xff] }
 0x1cf   :  { %v951_v21 = vshll.u32 %v4168_v27, 30  ;;  %v1460_v54 = vadd.s32 %v3788_v50, %v3808_v36  ;;  %v1618_v16 = vor.u32 8388608, %v1617_v13  ;;  %v1654_v22 = vsel %vm1642_vm3, %v1632_v6, %v1635_v44 }
 0x1d0   :  { %v1629_v10 = vor.u32 %v1628_v63, %v1627_v51  ;;  %v4178_v56 = vor.u32 %v754_v33, %v753_v1  ;;  %v4180_v52 = vsel %vm1928_vm13, 0, %v1927_v17  ;;  %vm1644_vm15 = vcmp.lt.s32.totalorder %v3062_v11, 3 }
 0x1d1   :  { %v4182_v41 = vsub.s32 %v948_v24, %v951_v21  ;;  %v758_v34 = vshll.u32 %v757_v53, 23  ;;  %vm1956_vm5 = vcmp.lt.s32.totalorder %v1955_v15, 0  ;;  %vm1643_vm12 = vcmp.lt.s32.totalorder %v3062_v11, 2 }
 0x1d2   :  { %v1656_v50 = vsel %vm1644_vm15, %v4920_v46, %v4919_v30  ;;  %v1478_v36 = vshrl.u32 %v1460_v54, %v1476_v55  ;;  %v1482_v28 = vshll.u32 %v1481_v62, 23  ;;  %v860_v21 = vsub.s32 4294967266, %v4180_v52 }
 0x1d3   :  { %v954_v29 = vsub.s32 0, %v4182_v41  ;;  %v1657_v17 = vsel %vm1643_vm12, %v1654_v22, %v1656_v50  ;;  %v1650_v24 = vsel %vm1642_vm3, %v1629_v10, %v1632_v6  ;;  %v1652_v13 = vsel %vm1644_vm15, %v1635_v44, %v4921_v61 }
 0x1d4   :  { %v1658_v63 = vshll.u32 %v1618_v16, 8  ;;  %2097 = vcosq.f32 %v664_v9  ;;  %v1477_v1 = vshll.u32 %v4028_v31, %v1475_v38  ;;  %v4200_v33 = vsel %vm1956_vm5, 0, %v1955_v15 }
 0x1d5   :  { %v1930_v53 = vmin.u32 %v954_v29, %v4182_v41  ;;  %v4203_v51 = vor.u32 4788187, %v758_v34  ;;  %v1647_v55 = vsel %vm1645_vm7, %v1635_v44, 2102212464  ;;  %v1483_v30 = vor.u32 4788187, %v1482_v28 }
 0x1d6   :  { %v4207_v62 = vmul.u32.u64.low %v1658_v63, %v1657_v17  ;;  %v4208_v54 = vmul.u32.u64.high %v1658_v63, %v1657_v17, %v4207_v62  ;;  %v1479_v22 = vor.u32 %v1478_v36, %v1477_v1  ;;  %v1626_v16 = vshrl.u32 %v4749_v43, %v3082_v40 }
 0x1d7   :  { %v1653_v31 = vsel %vm1643_vm12, %v1650_v24, %v1652_v13  ;;  %2099 = vsinq.f32 %v664_v9  ;;  %v1583_v15 = vsub.s32 4294967266, %v4200_v33  ;;  %v861_v34 = vadd.s32 127, %v860_v21  ;;  %v4922_v9 = vld [vmem:[#allocation70_spill] sm:$0xff]  ;;  %v4923_v62 = vld [vmem:[#allocation31_spill] sm:$0xff] }
 0x1d8   :  { %v956_v44 = vclz %v1930_v53  ;;  %v1646_v50 = vsel %vm1642_vm3, %v1626_v16, %v1629_v10  ;;  %v1648_v36 = vsel %vm1644_vm15, %v1632_v6, %v1647_v55  ;;  %v4694_v17 = vand.u32 2147483647, %v4922_v9 }
 0x1d9   :  { %v4222_v28 = vmul.u32.u64.low %v1658_v63, %v1653_v31  ;;  %v4223_v29 = vmul.u32.u64.high %v1658_v63, %v1653_v31, %v4222_v28  ;;  %v1484_v24 = vand.u32 2147483647, %v1483_v30  ;;  %v1486_v61 = vcvt.s32.f32 %v1479_v22  ;;  %v4924_v22 = vld [vmem:[#allocation19_spill] sm:$0xff] }
 0x1da   :  { %v1563_v21 = vadd.s32 %v3892_v8, %v3905_v19  ;;  %v1579_v13 = vsub.s32 32, %v4200_v33  ;;  %v1584_v1 = vadd.s32 127, %v1583_v15  ;;  %v856_v10 = vsub.s32 32, %v4180_v52 }
 0x1db   :  { %v862_v53 = vshll.u32 %v861_v34, 23  ;;  %v1649_v6 = vsel %vm1643_vm12, %v1646_v50, %v1648_v36  ;;  %v1931_v55 = vadd.s32 4294967294, %v956_v44  ;;  %vm1667_vm7 = vc.u32 %v4208_v54, %v4222_v28 }
 0x1dc   :  { %v1730_v30 = vshll.u32 %v4749_v43, %v4923_v62  ;;  %v1731_v16 = vshrl.u32 %v4745_v20, %v4924_v22  ;;  %v1668_v8 = vadd.s32 1, %v4223_v29  ;;  %v1720_v19 = vand.u32 8388607, %v4694_v17 }
 0x1dd   :  { %v1733_v31 = vshll.u32 %v4745_v20, %v4923_v62  ;;  %v1734_v11 = vshrl.u32 %v4746_v3, %v4924_v22  ;;  %v1665_v34 = vmul.u32 %v1658_v63, %v1649_v6  ;;  %v1736_v50 = vshll.u32 %v4746_v3, %v4923_v62 }
 0x1de   :  { %v4246_v15 = vpop.eup %2097  ;;  %v1732_v44 = vor.u32 %v1731_v16, %v1730_v30  ;;  %v1737_v36 = vshrl.u32 %v4718_v47, %v4924_v22  ;;  %v1487_v37 = vmul.f32 %v1486_v61, %v1484_v24  ;;  %v840_v17 = vadd.s32 %v3993_v23, %v3977_v14  ;;  %v4925_v23 = vld [vmem:[#allocation23_spill] sm:$0xff]  ;;  %v4926_v24 = vld [vmem:[#allocation29_spill] sm:$0xff] }
 0x1df   :  { %v1669_v46 = vsel %vm1667_vm7, %v1668_v8, %v4223_v29  ;;  %v1735_v20 = vor.u32 %v1734_v11, %v1733_v31  ;;  %v1581_v38 = vshrl.u32 %v1563_v21, %v1579_v13  ;;  %vm1932_vm6 = vcmp.lt.s32.totalorder %v1931_v55, 0 }
 0x1e0   :  { %v1670_v40 = vadd.s32 %v1669_v46, %v1665_v34  ;;  %v1738_v49 = vor.u32 %v1737_v36, %v1736_v50  ;;  %v1585_v63 = vshll.u32 %v1584_v1, 23  ;;  %v858_v6 = vshrl.u32 %v840_v17, %v856_v10  ;;  %v4927_v10 = vld [vmem:[#allocation22_spill] sm:$0xff] }
 0x1e1   :  { %v4255_v57 = vpop.eup %2099  ;;  %v1721_v30 = vor.u32 8388608, %v1720_v19  ;;  %vm1745_vm14 = vcmp.lt.s32.totalorder %v3073_v45, 1  ;;  %v863_v3 = vor.u32 4788187, %v862_v53  ;;  %vm1747_vm10 = vcmp.lt.s32.totalorder %v3073_v45, 3 }
 0x1e2   :  { %v1671_v47 = vadd.s32 536870912, %v1670_v40  ;;  %v1753_v14 = vsel %vm1745_vm14, %v1732_v44, %v1735_v20  ;;  %vm1406_vm11 = vcmp.lt.s32.totalorder %v4925_v23, 0  ;;  %v857_v46 = vshll.u32 %v4086_v2, %v4180_v52 }
 0x1e3   :  { %v4264_v29 = vsel %vm1932_vm6, 0, %v1931_v55  ;;  %v1729_v17 = vshrl.u32 %v4749_v43, %v4924_v22  ;;  %v1755_v61 = vsel %vm1747_vm10, %v1738_v49, %v4926_v24  ;;  %vm1746_vm8 = vcmp.lt.s32.totalorder %v3073_v45, 2  ;;  %v4928_v43 = vld [vmem:[#allocation35_spill] sm:$0xff] }
 0x1e4   :  { %v4271_v21 = vshrl.u32 %v1671_v47, 30  ;;  %v1750_v13 = vsel %vm1748_vm4, %v1738_v49, 2102212464  ;;  %v1757_v1 = vsel %vm1745_vm14, %v1735_v20, %v1738_v49  ;;  %v859_v2 = vor.u32 %v858_v6, %v857_v46 }
 0x1e5   :  { %v1756_v52 = vsel %vm1746_vm8, %v1753_v14, %v1755_v61  ;;  %v1759_v53 = vsel %vm1747_vm10, %v4928_v43, %v4927_v10  ;;  %v1761_v55 = vshll.u32 %v1721_v30, 8  ;;  %v4929_v62 = vand.u32 2147483647, %v4925_v23 }
 0x1e6   :  { %v864_v16 = vand.u32 2147483647, %v863_v3  ;;  %v964_v8 = vsub.s32 4294967266, %v4264_v29  ;;  %v1673_v49 = vshll.u32 %v4271_v21, 30  ;;  %v1749_v19 = vsel %vm1745_vm14, %v1729_v17, %v1732_v44 }
 0x1e7   :  { %vm4286_vm1 = vcmp.le.f32.partialorder %v4929_v62, 0.7853982  ;;  %vm675_vm4 = vcmp.eq.s32.totalorder %v4129_v42, 2  ;;  %v1751_v31 = vsel %vm1747_vm10, %v1735_v20, %v1750_v13  ;;  %v1760_v11 = vsel %vm1746_vm8, %v1757_v1, %v1759_v53 }
 0x1e8   :  { %v4299_v34 = vmul.u32.u64.low %v1761_v55, %v1756_v52  ;;  %v4300_v50 = vmul.u32.u64.high %v1761_v55, %v1756_v52, %v4299_v34  ;;  %v4932_v36 = vand.u32 2147483647, %v4203_v51  ;;  %v4933_v6 = vcvt.s32.f32 %v4178_v56 }
 0x1e9   :  { %v1488_v3 = vxor.u32 2147483648, %v1487_v37  ;;  %v1580_v44 = vshll.u32 %v4099_v60, %v4200_v33  ;;  %v4309_v47 = vsub.s32 %v1670_v40, %v1673_v49  ;;  %v1586_v14 = vor.u32 4788187, %v1585_v63 }
 0x1ea   :  { %v763_v30 = vmul.f32 %v4933_v6, %v4932_v36  ;;  %v866_v20 = vcvt.s32.f32 %v859_v2  ;;  %v4311_v46 = vmul.u32.u64.low %v1761_v55, %v1760_v11  ;;  %v4312_v17 = vmul.u32.u64.high %v1761_v55, %v1760_v11, %v4311_v46  ;;  %v4936_v6 = vld [vmem:[#allocation34_spill] sm:$0xff] }
 0x1eb   :  { %v676_v24 = vxor.u32 2147483648, %v4246_v15  ;;  %v965_v61 = vadd.s32 127, %v964_v8  ;;  %v1676_v13 = vsub.s32 0, %v4309_v47  ;;  %v1752_v56 = vsel %vm1746_vm8, %v1749_v19, %v1751_v31 }
 0x1ec   :  { %v673_v51 = vxor.u32 2147483648, %v4255_v57  ;;  %v1582_v1 = vor.u32 %v1581_v38, %v1580_v44  ;;  %v867_v52 = vmul.f32 %v866_v20, %v864_v16  ;;  %v1771_v60 = vadd.s32 1, %v4300_v50 }
 0x1ed   :  { %v1489_v33 = vsel %vm1406_vm11, %v1488_v3, %v1487_v37  ;;  %v4934_v40 = vsub.s32 4, %v3956_v32  ;;  %v960_v2 = vsub.s32 32, %v4264_v29  ;;  %v1958_v45 = vmin.u32 %v1676_v13, %v4309_v47 }
 0x1ee   :  { %v764_v10 = vxor.u32 2147483648, %v763_v30  ;;  %v1587_v43 = vand.u32 2147483647, %v1586_v14  ;;  %v1768_v53 = vmul.u32 %v1761_v55, %v1752_v56  ;;  %vm1770_vm0 = vc.u32 %v4312_v17, %v4299_v34 }
 0x1ef   :  { %v1491_v63 = vsel %vm1406_vm11, %v4934_v40, %v3956_v32  ;;  %vm672_vm13 = vcmp.eq.s32.totalorder %v4129_v42, 0  ;;  %v944_v37 = vadd.s32 %v4122_v0, %v4118_v59  ;;  %v966_v38 = vshll.u32 %v965_v61, 23 }
 0x1f0   :  { %v1678_v62 = vclz %v1958_v45  ;;  %v1772_v16 = vsel %vm1770_vm0, %v1771_v60, %v4300_v50  ;;  %v1492_v32 = vsel %vm4286_vm1, %v4925_v23, %v1489_v33  ;;  %v1589_v8 = vcvt.s32.f32 %v1582_v1  ;;  %v4935_v50 = vld [vmem:[#allocation27_spill] sm:$0xff] }
 0x1f1   :  { %v868_v49 = vxor.u32 2147483648, %v867_v52  ;;  %v1773_v19 = vadd.s32 %v1772_v16, %v1768_v53  ;;  %v677_v55 = vsel %vm675_vm4, %v676_v24, %v4255_v57  ;;  %v1493_v31 = vsel %vm4286_vm1, 0, %v1491_v63 }
 0x1f2   :  { %v962_v11 = vshrl.u32 %v944_v37, %v960_v2  ;;  %v1959_v59 = vadd.s32 4294967294, %v1678_v62  ;;  %v765_v0 = vsel %vm682_vm2, %v764_v10, %v763_v30  ;;  %vm1509_vm3 = vcmp.lt.s32.totalorder %v4935_v50, 0 }
 0x1f3   :  { %v1590_v36 = vmul.f32 %v1589_v8, %v1587_v43  ;;  %vm786_vm15 = vcmp.lt.s32.totalorder %v4936_v6, 0  ;;  %v1774_v3 = vadd.s32 536870912, %v1773_v19  ;;  %vm671_vm5 = vcmp.lt.s32.totalorder %v4129_v42, 2 }
 0x1f4   :  { %2101 = vcosq.f32 %v1492_v32  ;;  %v961_v57 = vshll.u32 %v4182_v41, %v4264_v29  ;;  %v967_v44 = vor.u32 4788187, %v966_v38  ;;  %vm1960_vm12 = vcmp.lt.s32.totalorder %v1959_v59, 0 }
 0x1f5   :  { %2103 = vsinq.f32 %v1492_v32  ;;  %v869_v22 = vsel %vm786_vm15, %v868_v49, %v867_v52  ;;  %v1681_v14 = vsel %vm1960_vm12, 0, %v1959_v59  ;;  %v4352_v30 = vshrl.u32 %v1774_v3, 30 }
 0x1f6   :  { %v963_v20 = vor.u32 %v962_v11, %v961_v57  ;;  %v1666_v46 = vadd.s32 %v4222_v28, %v4208_v54  ;;  %v1682_v24 = vsub.s32 32, %v1681_v14  ;;  %v1686_v61 = vsub.s32 4294967266, %v1681_v14 }
 0x1f7   :  { %v1591_v13 = vxor.u32 2147483648, %v1590_v36  ;;  %v4937_v56 = vand.u32 2147483647, %v4936_v6  ;;  %v870_v29 = vsub.s32 4, %v4071_v4  ;;  %v1776_v1 = vshll.u32 %v4352_v30, 30 }
 0x1f8   :  { %v968_v52 = vand.u32 2147483647, %v967_v44  ;;  %v1683_v60 = vshll.u32 %v4309_v47, %v1681_v14  ;;  %v1684_v33 = vshrl.u32 %v1666_v46, %v1682_v24  ;;  %v1687_v40 = vadd.s32 127, %v1686_v61 }
 0x1f9   :  { %vm4358_vm2 = vcmp.le.f32.partialorder %v4937_v56, 0.7853982  ;;  %v674_v54 = vsel %vm672_vm13, %v4246_v15, %v673_v51  ;;  %v1593_v28 = vsub.s32 4, %v4055_v26  ;;  %v4372_v2 = vsub.s32 %v1773_v19, %v1776_v1 }
 0x1fa   :  { %v872_v63 = vsel %vm4358_vm2, %v4936_v6, %v869_v22  ;;  %v4374_v45 = vand.u32 3, %v1493_v31  ;;  %v970_v10 = vcvt.s32.f32 %v963_v20  ;;  %v1685_v43 = vor.u32 %v1684_v33, %v1683_v60 }
 0x1fb   :  { %v1688_v53 = vshll.u32 %v1687_v40, 23  ;;  %v768_v47 = vsel %vm4061_vm9, %v4864_v35, %v765_v0  ;;  %v4940_v37 = vand.u32 2147483647, %v4935_v50  ;;  %v871_v51 = vsel %vm786_vm15, %v870_v29, %v4071_v4 }
 0x1fc   :  { %v1779_v38 = vsub.s32 0, %v4372_v2  ;;  %v1592_v62 = vsel %vm1509_vm3, %v1591_v13, %v1590_v36  ;;  %2105 = vcosq.f32 %v872_v63  ;;  %v971_v16 = vmul.f32 %v970_v10, %v968_v52 }
 0x1fd   :  { %vm4381_vm7 = vcmp.le.f32.partialorder %v4940_v37, 0.7853982  ;;  %v1689_v32 = vor.u32 4788187, %v1688_v53  ;;  %v678_v5 = vsel %vm671_vm5, %v674_v54, %v677_v55  ;;  %v1594_v8 = vsel %vm1509_vm3, %v1593_v28, %v4055_v26 }
 0x1fe   :  { %2107 = vsinq.f32 %v872_v63  ;;  %v1962_v49 = vmin.u32 %v1779_v38, %v4372_v2  ;;  %v2102_v19 = vpop.eup %2101  ;;  %vm1499_vm9 = vcmp.eq.s32.totalorder %v4374_v45, 0  ;;  %vm1502_vm6 = vcmp.eq.s32.totalorder %v4374_v45, 2 }
 0x1ff   :  { %v1690_v4 = vand.u32 2147483647, %v1689_v32  ;;  %v1692_v31 = vcvt.s32.f32 %v1685_v43  ;;  %v2104_v11 = vpop.eup %2103  ;;  %vm668_vm14 = vweird.f32 %v4841_v48  ;;  %2109 = vcosq.f32 %v768_v47 }
 0x200   :  { %v1595_v42 = vsel %vm4381_vm7, %v4935_v50, %v1592_v62  ;;  %v873_v26 = vsel %vm4358_vm2, 0, %v871_v51  ;;  %v1781_v55 = vclz %v1962_v49  ;;  %2111 = vsinq.f32 %v768_v47  ;;  %v4450_v51 = vpop.permute.xlu1 %93 }
 0x201   :  { %v1596_v59 = vsel %vm4381_vm7, 0, %v1594_v8  ;;  %v972_v0 = vxor.u32 2147483648, %v971_v16  ;;  %v1693_v36 = vmul.f32 %v1692_v31, %v1690_v4  ;;  %vm356_vm10 = vweird.f32 %v4820_v12 }
 0x202   :  { %v1503_v3 = vxor.u32 2147483648, %v2102_v19  ;;  %v4943_v57 = vand.u32 2147483647, %v4906_v58  ;;  %vm890_vm8 = vcmp.lt.s32.totalorder %v4906_v58, 0  ;;  %v1963_v22 = vadd.s32 4294967294, %v1781_v55 }
 0x203   :  { %v1500_v14 = vxor.u32 2147483648, %v2104_v11  ;;  %2113 = vcosq.f32 %v1595_v42  ;;  %v877_v20 = vadd.s32 3, %v873_v26  ;;  %v1694_v46 = vxor.u32 2147483648, %v1693_v36 }
 0x204   :  { %vm4410_vm11 = vcmp.le.f32.partialorder %v4943_v57, 0.7853982  ;;  %vm1496_vm1 = vweird.f32 %v4925_v23  ;;  %2115 = vsinq.f32 %v1595_v42  ;;  %v4946_v24 = vand.u32 2147483647, %v4917_v18  ;;  %v4470_v42 = vpop.permute.xlu1 %109 }
 0x205   :  { %vm1612_vm0 = vcmp.lt.s32.totalorder %v4917_v18, 0  ;;  %vm1964_vm13 = vcmp.lt.s32.totalorder %v1963_v22, 0  ;;  %v973_v13 = vsel %vm890_vm8, %v972_v0, %v971_v16  ;;  %v1696_v41 = vsub.s32 4, %v4271_v21 }
 0x206   :  { %vm4418_vm4 = vcmp.le.f32.partialorder %v4946_v24, 0.7853982  ;;  %v1695_v56 = vsel %vm1612_vm0, %v1694_v46, %v1693_v36  ;;  %v1784_v29 = vsel %vm1964_vm13, 0, %v1963_v22  ;;  %v1769_v52 = vadd.s32 %v4299_v34, %v4312_v17  ;;  %v2106_v40 = vpop.eup %2105  ;;  %v4949_v46 = vld [vmem:[#allocation7_spill] sm:$0xff] }
 0x207   :  { %v1698_v1 = vsel %vm4418_vm4, %v4917_v18, %v1695_v56  ;;  %v1785_v60 = vsub.s32 32, %v1784_v29  ;;  %v1789_v33 = vsub.s32 4294967266, %v1784_v29  ;;  %v1501_v54 = vsel %vm1499_vm9, %v2102_v19, %v1500_v14 }
 0x208   :  { %v1504_v28 = vsel %vm1502_vm6, %v1503_v3, %v2104_v11  ;;  %v974_v63 = vsub.s32 4, %v4168_v27  ;;  %2117 = vcosq.f32 %v1698_v1  ;;  %v2108_v10 = vpop.eup %2107  ;;  %v1786_v43 = vshll.u32 %v4372_v2, %v1784_v29 }
 0x209   :  { %2119 = vsinq.f32 %v1698_v1  ;;  %v1787_v53 = vshrl.u32 %v1769_v52, %v1785_v60  ;;  %v1790_v47 = vadd.s32 127, %v1789_v33  ;;  %v679_v34 = vsel %vm668_vm14, nan, %v678_v5  ;;  %v4448_v15 = vpop.eup %2109 }
 0x20a   :  { %vm1498_vm3 = vcmp.lt.s32.totalorder %v4374_v45, 2  ;;  %v976_v17 = vsel %vm4410_vm11, %v4906_v58, %v973_v13  ;;  %v1697_v37 = vsel %vm1612_vm0, %v1696_v41, %v4271_v21  ;;  %v878_v38 = vand.u32 3, %v877_v20  ;;  %v4452_v48 = vpop.eup %2111 }
 0x20b   :  { %v1505_v2 = vsel %vm1498_vm3, %v1501_v54, %v1504_v28  ;;  %v1788_v62 = vor.u32 %v1787_v53, %v1786_v43  ;;  %v1791_v16 = vshll.u32 %v1790_v47, 23  ;;  %v4457_v45 = vsel %vm356_vm10, nan, %v4150_v39  ;;  %v4493_v54 = vpop.permute.xlu0 %97 }
 0x20c   :  { %v4459_v32 = vand.u32 3, %v1596_v59  ;;  %v881_v5 = vxor.u32 2147483648, %v2108_v10  ;;  %v884_v8 = vxor.u32 2147483648, %v2106_v40  ;;  %v975_v21 = vsel %vm890_vm8, %v974_v63, %v4168_v27 }
 0x20d   :  { %2121 = vcosq.f32 %v976_v17  ;;  %v1699_v49 = vsel %vm4418_vm4, 0, %v1697_v37  ;;  %v1792_v19 = vor.u32 4788187, %v1791_v16  ;;  %v2114_v4 = vpop.eup %2113  ;;  %v780_v31 = vxor.u32 2147483648, %v4448_v15 }
 0x20e   :  { %v1820_v12 = vmul.f32 %v679_v34, %v4450_v51  ;;  %v1506_v39 = vsel %vm1496_vm1, nan, %v1505_v2  ;;  %2123 = vsinq.f32 %v976_v17  ;;  %v2116_v11 = vpop.eup %2115  ;;  %vm880_vm15 = vcmp.eq.s32.totalorder %v878_v38, 0  ;;  %v114_v34 = vpop.permute.xlu1 %113 }
 0x20f   :  { %vm883_vm5 = vcmp.eq.s32.totalorder %v878_v38, 2  ;;  %v1793_v27 = vand.u32 2147483647, %v1792_v19  ;;  %v1795_v26 = vcvt.s32.f32 %v1788_v62  ;;  %v882_v55 = vsel %vm880_vm15, %v2106_v40, %v881_v5 }
 0x210   :  { %v885_v59 = vsel %vm883_vm5, %v884_v8, %v2108_v10  ;;  %v977_v0 = vsel %vm4410_vm11, 0, %v975_v21  ;;  %v1703_v36 = vand.u32 3, %v1699_v49  ;;  %vm776_vm12 = vcmp.eq.s32.totalorder %v4144_v25, 0 }
 0x211   :  { %v777_v3 = vxor.u32 2147483648, %v4452_v48  ;;  %vm779_vm2 = vcmp.eq.s32.totalorder %v4144_v25, 2  ;;  %vm1605_vm7 = vcmp.eq.s32.totalorder %v4459_v32, 2  ;;  %vm876_vm9 = vweird.f32 %v4936_v6 }
 0x212   :  { %v1796_v23 = vmul.f32 %v1795_v26, %v1793_v27  ;;  %v2118_v57 = vpop.eup %2117  ;;  %v1603_v22 = vxor.u32 2147483648, %v2116_v11  ;;  %v1606_v14 = vxor.u32 2147483648, %v2114_v4  ;;  %v1828_v20 = vmul.f32 %v1506_v39, %v4470_v42  ;;  %v4954_v39 = vld [vmem:[#allocation37_spill] sm:$0xff] }
 0x213   :  { %vm879_vm6 = vcmp.lt.s32.totalorder %v878_v38, 2  ;;  %v2120_v44 = vpop.eup %2119  ;;  %vm1393_vm14 = vweird.f32 %v4949_v46  ;;  %v981_v61 = vadd.s32 3, %v977_v0  ;;  %v1709_v13 = vxor.u32 2147483648, %v2118_v57 }
 0x214   :  { %v886_v24 = vsel %vm879_vm6, %v882_v55, %v885_v59  ;;  %v1797_v56 = vxor.u32 2147483648, %v1796_v23  ;;  %v1706_v41 = vxor.u32 2147483648, %v2120_v44  ;;  %vm1708_vm10 = vcmp.eq.s32.totalorder %v1703_v36, 2 }
 0x215   :  { %v4950_v29 = vand.u32 2147483647, %v4922_v9  ;;  %vm1715_vm8 = vcmp.lt.s32.totalorder %v4922_v9, 0  ;;  %vm1705_vm1 = vcmp.eq.s32.totalorder %v1703_v36, 0  ;;  %v1710_v52 = vsel %vm1708_vm10, %v1709_v13, %v2120_v44 }
 0x216   :  { %v1798_v60 = vsel %vm1715_vm8, %v1797_v56, %v1796_v23  ;;  %v1799_v33 = vsub.s32 4, %v4352_v30  ;;  %v887_v40 = vsel %vm876_vm9, nan, %v886_v24  ;;  %vm1704_vm4 = vcmp.lt.s32.totalorder %v1703_v36, 2  ;;  %v4957_v23 = vld [vmem:[#allocation17_spill] sm:$0xff] }
 0x217   :  { %vm4483_vm11 = vcmp.le.f32.partialorder %v4950_v29, 0.7853982  ;;  %v1707_v28 = vsel %vm1705_vm1, %v2118_v57, %v1706_v41  ;;  %v2122_v10 = vpop.eup %2121  ;;  %v1836_v43 = vadd.f32 %v1828_v20, %v1820_v12  ;;  %vm1702_vm0 = vweird.f32 %v4917_v18  ;;  %v4958_v57 = vld [vmem:[#allocation24_spill] sm:$0xff] }
 0x218   :  { %v1801_v63 = vsel %vm4483_vm11, %v4922_v9, %v1798_v60  ;;  %v1711_v53 = vsel %vm1704_vm4, %v1707_v28, %v1710_v52  ;;  %v2124_v47 = vpop.eup %2123  ;;  %vm1602_vm13 = vcmp.eq.s32.totalorder %v4459_v32, 0  ;;  %v1607_v6 = vsel %vm1605_vm7, %v1606_v14, %v2116_v11  ;;  %v4956_v11 = vld [vmem:[#allocation11_spill] sm:$0xff] }
 0x219   :  { %2125 = vcosq.f32 %v1801_v63  ;;  %v1712_v17 = vsel %vm1702_vm0, nan, %v1711_v53  ;;  %v1604_v37 = vsel %vm1602_vm13, %v2114_v4, %v1603_v22  ;;  %v1822_v2 = vmul.f32 %v887_v40, %v4493_v54  ;;  %v4953_v4 = vld [vmem:[#allocation32_spill] sm:$0xff]  ;;  %v4959_v14 = vld [vmem:[#allocation39_spill] sm:$0xff] }
 0x21a   :  { %2127 = vsinq.f32 %v1801_v63  ;;  %v1800_v38 = vsel %vm1715_vm8, %v1799_v33, %v4352_v30  ;;  %v1830_v62 = vmul.f32 %v1712_v17, %v114_v34  ;;  %v778_v18 = vsel %vm776_vm12, %v4448_v15, %v777_v3 }
 0x21b   :  { %v781_v16 = vsel %vm779_vm2, %v780_v31, %v4452_v48  ;;  %vm1601_vm3 = vcmp.lt.s32.totalorder %v4459_v32, 2  ;;  %v982_v5 = vand.u32 3, %v981_v61  ;;  %v1841_v8 = vadd.f32 %v4138_v7, %v1836_v43  ;;  %v4955_v48 = vld [vmem:[#allocation6_spill] sm:$0xff] }
 0x21c   :  { %v985_v21 = vxor.u32 2147483648, %v2124_v47  ;;  %v988_v49 = vxor.u32 2147483648, %v2122_v10  ;;  %v1838_v19 = vadd.f32 %v1830_v62, %v1822_v2  ;;  %v1403_v30 = vsel %vm1393_vm14, nan, %v4953_v4 }
 0x21d   :  { %vm775_vm15 = vcmp.lt.s32.totalorder %v4144_v25, 2  ;;  %v1608_v12 = vsel %vm1601_vm3, %v1604_v37, %v1607_v6  ;;  %v1802_v15 = vsel %vm4483_vm11, 0, %v1800_v38  ;;  %v1825_v31 = vmul.f32 %v4955_v48, %v4954_v39 }
 0x21e   :  { %vm772_vm5 = vweird.f32 %v4864_v35  ;;  %v782_v32 = vsel %vm775_vm15, %v778_v18, %v781_v16  ;;  %v1842_v7 = vadd.f32 %v1841_v8, %v1838_v19  ;;  %v1817_v27 = vmul.f32 %v4457_v45, %v4956_v11 }
 0x21f   :  { %vm1599_vm12 = vweird.f32 %v4935_v50  ;;  %vm984_vm2 = vcmp.eq.s32.totalorder %v982_v5, 0  ;;  %vm987_vm7 = vcmp.eq.s32.totalorder %v982_v5, 2  ;;  %v1806_v59 = vand.u32 3, %v1802_v15 }
 0x220   :  { %v1609_v26 = vsel %vm1599_vm12, nan, %v1608_v12  ;;  %v986_v25 = vsel %vm984_vm2, %v2122_v10, %v985_v21  ;;  %v989_v55 = vsel %vm987_vm7, %v988_v49, %v2124_v47  ;;  %v783_v0 = vsel %vm772_vm5, nan, %v782_v32 }
 0x221   :  { %v1843_v36 = vrot.slane %v1842_v7, 4  ;;  %v1819_v22 = vmul.f32 %v4958_v57, %v4957_v23  ;;  %vm983_vm9 = vcmp.lt.s32.totalorder %v982_v5, 2  ;;  %v1827_v20 = vmul.f32 %v1403_v30, %v4959_v14 }
 0x222   :  { %v1829_v45 = vmul.f32 %v1609_v26, %v4470_v42  ;;  %v990_v44 = vsel %vm983_vm9, %v986_v25, %v989_v55  ;;  %v1833_v46 = vadd.f32 %v1825_v31, %v1817_v27  ;;  %v1821_v24 = vmul.f32 %v783_v0, %v4450_v51 }
 0x223   :  { %v2126_v3 = vpop.eup %2125  ;;  %vm1811_vm6 = vcmp.eq.s32.totalorder %v1806_v59, 2  ;;  %vm980_vm14 = vweird.f32 %v4906_v58  ;;  %vm1808_vm10 = vcmp.eq.s32.totalorder %v1806_v59, 0  ;;  %v1844_v56 = vadd.f32 %v1843_v36, %v1842_v7 }
 0x224   :  { %v2128_v35 = vpop.eup %2127  ;;  %v1812_v50 = vxor.u32 2147483648, %v2126_v3  ;;  %v991_v41 = vsel %vm980_vm14, nan, %v990_v44  ;;  %vm1807_vm11 = vcmp.lt.s32.totalorder %v1806_v59, 2  ;;  %v1835_v1 = vadd.f32 %v1827_v20, %v1819_v22 }
 0x225   :  { %v1809_v61 = vxor.u32 2147483648, %v2128_v35  ;;  %v1837_v52 = vadd.f32 %v1829_v45, %v1821_v24  ;;  %vm1805_vm8 = vweird.f32 %v4922_v9  ;;  %v1823_v40 = vmul.f32 %v991_v41, %v4493_v54  ;;  %v1860_v9 = vpop.permute.xlu1 %1859  ;;  %v4960_v54 = vld [vmem:[#allocation5_spill] sm:$0xff] }
 0x226   :  { %v1813_v13 = vsel %vm1811_vm6, %v1812_v50, %v2128_v35  ;;  %v1849_v33 = vadd.f32 %v1835_v1, %v1833_v46  ;;  %v1845_v28 = vrot.slane %v1844_v56, 2  ;;  %v2166_v17 = vmov 1966171168  }
 0x227   :  { %v1810_v29 = vsel %vm1808_vm10, %v2126_v3, %v1809_v61  ;;  %v1868_v37 = vunpack.c.l.s4 %v2166_v17  ;;  %v4961_v4 = vlaneseq }
 0x228   :  { %v1814_v42 = vsel %vm1807_vm11, %v1810_v29, %v1813_v13  ;;  %v1850_v63 = vadd.f32 %v1849_v33, %v1837_v52  ;;  %v1846_v43 = vadd.f32 %v1845_v28, %v1844_v56 }
 0x229   :  { %v1815_v60 = vsel %vm1805_vm8, nan, %v1814_v42  ;;  %v1869_v18 = vunpack.c.0.s8 %v1868_v37  ;;  %vm1884_vm1 = vcmp.lt.s32.totalorder %v4961_v4, 256 }
 0x22a   :  { %v1831_v51 = vmul.f32 %v1815_v60, %v114_v34  ;;  %v1847_v47 = vrot.slane %v1846_v43, 1 }
 0x22b   :  { %v1872_v34 = vsub.s32 %v1869_v18, %v4960_v54 }
 0x22c   :  { %v1839_v10 = vadd.f32 %v1831_v51, %v1823_v40  ;;  %v1848_v38 = vadd.f32 %v1847_v47, %v1846_v43 }
 0x22e   :  { %v1851_v58 = vadd.f32 %v1850_v63, %v1839_v10  ;;  %v1862_v8 = vadd.f32 %v1860_v9, %v1848_v38 }
 0x230   :  { %v1852_v53 = vrot.slane %v1851_v58, 4 }
 0x232   :  { %v1853_v6 = vadd.f32 %v1852_v53, %v1851_v58 }
 0x234   :  { %v1854_v2 = vrot.slane %v1853_v6, 2 }
 0x236   :  { %v1855_v62 = vadd.f32 %v1854_v2, %v1853_v6 }
 0x238   :  { %v1856_v16 = vrot.slane %v1855_v62, 1 }
 0x23a   :  { %v1857_v5 = vadd.f32 %v1856_v16, %v1855_v62 }
 0x23c   :  { %v1863_v21 = vadd.f32 %v1860_v9, %v1857_v5 }
 0x23e   :  { %v1866_v49 = vcombine.low %v1862_v8, %v1863_v21 }
 0x240   :  { %v1873_v19 = vrot.slane %v1866_v49, %v1872_v34 }
 0x242   :  { %v1880_v30 = vrot.slane %v1873_v19, %v1872_v34 }
 0x244   :  { %1886 = vst.msk [vmem:[#allocation2] sm:$0x3] %vm1884_vm1, %v1880_v30 }
 0x245   :  { %1891 = vsyncadd [#allocation3], 16  ;;  %s2167_s0 = smov [#allocation2]  }
 0x246   :  { %s1893_s18 = sshll.u32 %s2167_s0, 4  ;;  %s1894_s18 = int_to_ptr.vmem [resolvable:$true] %s1893_s18 }
 0x247   :  { %s2129_s19 = scalar_lea.vmem %s1894_s18, 16  ;;  %s2133_s20 = scalar_lea.vmem %s1894_s18, 32 }
 0x248   :  { %p2130_p0 = scmp.ne.s32.totalorder %s1894_s18, %s2129_s19  ;;  %p2134_p1 = scmp.lt.s32.totalorder %s1894_s18, %s1894_s18 }
 0x249   :  { %p2135_p2 = scmp.lt.s32.totalorder %s2133_s20, %s2129_s19 }
 0x24b   :  { %p2136_p3 = por %p2135_p2, %p2134_p1 }
 0x24d   :  { %p2137_p4 = pnand %p2136_p3, %p2130_p0 }
 0x24f   :  { %2140 = shalt.err (!%p2137_p4)
}
 0x250   :  { %s2141_s23 = scalar_lea.hbm %s4550_s2, 16 }
 0x251   :  { %p2142_p5 = scmp.ne.s32.totalorder %s4550_s2, %s2141_s23  ;;  %p2145_p6 = scmp.lt.u32.totalorder %s2141_s23, %s4550_s2 }
 0x253   :  { %p2147_p7 = pnand %p2145_p6, %p2142_p5 }
 0x255   :  { %2150 = shalt.err (!%p2147_p7)
}
 0x256   :  { %1896 = dma.vmem_to_hbm [thread:$0]  %s1894_s18, 16, %s4550_s2, [#allocation3]  }
 0x257   :  { %2151 = dma.done.wait [#allocation3], 32  }
 0x258   :  { %2152 = vsyncadd [#allocation3], 4294967264 }
 0x259   :  { %1900 = vsyncpa [#allocation3], 1 }

</bundles_post_ra>
